<compile_context>
chip_gen: v5e
topology: v5e:2x2
jax: 0.10.0
libtpu: 0.0.40
codegen_flags: <defaults>
</compile_context>

<pallas_src>
import functools

import jax
import jax.numpy as jnp
from jax.experimental import pallas as pl
from jax.experimental.pallas import tpu as pltpu


def _layernorm(x, gamma, beta, eps=1e-5):
    mu = jnp.mean(x, axis=-1, keepdims=True)
    var = jnp.mean((x - mu) ** 2, axis=-1, keepdims=True)
    return (x - mu) * jax.lax.rsqrt(var + eps) * gamma + beta


# ---------------------------------------------------------------------------
# Pass 1: LN1 + fused QKV projection, once per token, head-major outputs.
# ---------------------------------------------------------------------------
def qkv_kernel(x_ref, ln1_g_ref, ln1_b_ref, wqkv_ref, bqkv_ref,
               q_ref, k_ref, v_ref, *, n_head, compute_dtype):
    f32 = jnp.float32
    x = x_ref[0]                                        # (TR, C)
    TR, C = x.shape
    H = n_head
    Dh = C // H

    nx = _layernorm(x, ln1_g_ref[0], ln1_b_ref[0])
    qkv = jnp.dot(nx.astype(compute_dtype), wqkv_ref[...],
                  preferred_element_type=f32) + bqkv_ref[0]       # (TR, 3C) f32

    scale = f32(1.0 / (Dh ** 0.5))

    def to_heads(z):                                    # (TR, C) -> (H, TR, Dh)
        return jnp.transpose(z.reshape(TR, H, Dh), (1, 0, 2))

    q_ref[0] = to_heads(qkv[:, :C] * scale).astype(q_ref.dtype)
    k_ref[0] = to_heads(qkv[:, C:2 * C]).astype(k_ref.dtype)
    v_ref[0] = to_heads(qkv[:, 2 * C:]).astype(v_ref.dtype)


# ---------------------------------------------------------------------------
# Pass 2: causal flash attention over key tiles + out-proj/LN2/FFN epilogue.
# Grid = (B, n_q, n_k), TQ == TK == q_block.
# ---------------------------------------------------------------------------
def attn_ffn_kernel(xq_ref, q_ref, k_ref, v_ref,
                    ln2_g_ref, ln2_b_ref,
                    wo_ref, bo_ref, w1_ref, b1_ref, w2_ref, b2_ref,
                    o_ref,
                    m_sc, l_sc, acc_sc,
                    *, compute_dtype):
    f32 = jnp.float32
    cdt = compute_dtype
    q_idx = pl.program_id(1)
    k_idx = pl.program_id(2)
    n_k = pl.num_programs(2)

    @pl.when(k_idx == 0)
    def _init():
        m_sc[...] = jnp.full_like(m_sc, -1e30)
        l_sc[...] = jnp.zeros_like(l_sc)
        acc_sc[...] = jnp.zeros_like(acc_sc)

    # Causal skip: with TQ == TK, key tile k contributes only when k <= q.
    @pl.when(k_idx <= q_idx)
    def _compute():
        qh = q_ref[0]                                   # (H, TQ, Dh)
        kh = k_ref[0]                                   # (H, TK, Dh)
        vh = v_ref[0]                                   # (H, TK, Dh)
        H, TQ, Dh = qh.shape
        TK = kh.shape[1]

        s = jnp.einsum('hqd,hkd->hqk', qh.astype(cdt), kh.astype(cdt),
                       preferred_element_type=f32)      # (H, TQ, TK)

        # Intra-tile causal mask (large finite negative bias; only the diagonal
        # tile actually masks anything).
        qpos = q_idx * TQ + jax.lax.broadcasted_iota(jnp.int32, (TQ, TK), 0)
        kpos = k_idx * TK + jax.lax.broadcasted_iota(jnp.int32, (TQ, TK), 1)
        s = s + jnp.where(kpos > qpos, f32(-1e30), f32(0.0))[None]

        m_prev = m_sc[...]
        m_new = jnp.maximum(m_prev, jnp.max(s, axis=-1, keepdims=True))
        alpha = jnp.exp(m_prev - m_new)
        p = jnp.exp(s - m_new)
        l_sc[...] = alpha * l_sc[...] + jnp.sum(p, axis=-1, keepdims=True)
        acc_sc[...] = alpha * acc_sc[...] + jnp.einsum(
            'hqk,hkd->hqd', p.astype(cdt), vh.astype(cdt),
            preferred_element_type=f32)
        m_sc[...] = m_new

    @pl.when(k_idx == n_k - 1)
    def _finalize():
        xq = xq_ref[0]                                  # (TQ, C) f32 residual tile
        TQ, C = xq.shape

        if compute_dtype == jnp.float32:
            ctx = acc_sc[...] / l_sc[...]               # exact path for f32 checks
        else:
            ctx = acc_sc[...] * pl.reciprocal(l_sc[...], approx=True)   # EUP slot
        attn = jnp.transpose(ctx, (1, 0, 2)).reshape(TQ, C)             # (TQ, C)

        sa = jnp.dot(attn.astype(cdt), wo_ref[...],
                     preferred_element_type=f32) + bo_ref[0]
        x1 = xq + sa

        n2 = _layernorm(x1, ln2_g_ref[0], ln2_b_ref[0])
        h1 = jnp.maximum(
            jnp.dot(n2.astype(cdt), w1_ref[...],
                    preferred_element_type=f32) + b1_ref[0], 0.0)
        ff = jnp.dot(h1.astype(cdt), w2_ref[...],
                     preferred_element_type=f32) + b2_ref[0]

        o_ref[0] = (x1 + ff).astype(o_ref.dtype)


# ---------------------------------------------------------------------------
# Wrapper / parameter prep
# ---------------------------------------------------------------------------
def make_block_params(key, n_embd):
    """PyTorch-layout parameters (Linear weights are (out_features, in_features))."""
    ks = jax.random.split(key, 8)
    s = 0.02
    f32 = jnp.float32
    return {
        'ln1_g': jnp.ones((1, n_embd), f32), 'ln1_b': jnp.zeros((1, n_embd), f32),
        'ln2_g': jnp.ones((1, n_embd), f32), 'ln2_b': jnp.zeros((1, n_embd), f32),
        'wq': jax.random.normal(ks[0], (n_embd, n_embd), f32) * s,
        'bq': jnp.zeros((1, n_embd), f32),
        'wk': jax.random.normal(ks[1], (n_embd, n_embd), f32) * s,
        'bk': jnp.zeros((1, n_embd), f32),
        'wv': jax.random.normal(ks[2], (n_embd, n_embd), f32) * s,
        'bv': jnp.zeros((1, n_embd), f32),
        'wo': jax.random.normal(ks[3], (n_embd, n_embd), f32) * s,
        'bo': jnp.zeros((1, n_embd), f32),
        'w1': jax.random.normal(ks[4], (4 * n_embd, n_embd), f32) * s,
        'b1': jax.random.normal(ks[5], (1, 4 * n_embd), f32) * s,
        'w2': jax.random.normal(ks[6], (n_embd, 4 * n_embd), f32) * s,
        'b2': jax.random.normal(ks[7], (1, n_embd), f32) * s,
    }


def prepare_params(params, compute_dtype=jnp.float32):
    """One-time prep: transpose to (in, out), fuse QKV, optional bf16 weights."""
    cdt = compute_dtype
    w_qkv = jnp.concatenate(
        [params['wq'].T, params['wk'].T, params['wv'].T], axis=1).astype(cdt)   # (C,3C)
    b_qkv = jnp.concatenate([params['bq'], params['bk'], params['bv']], axis=1)  # (1,3C)
    return {
        'ln1_g': params['ln1_g'], 'ln1_b': params['ln1_b'],
        'ln2_g': params['ln2_g'], 'ln2_b': params['ln2_b'],
        'w_qkv': w_qkv, 'b_qkv': b_qkv,
        'w_o': params['wo'].T.astype(cdt), 'b_o': params['bo'],
        'w1': params['w1'].T.astype(cdt), 'b1': params['b1'],
        'w2': params['w2'].T.astype(cdt), 'b2': params['b2'],
    }


def _default_vmem_limit():
    """Physical VMEM minus headroom (v7x: ~56 MiB, v5e/v6e: 112 MiB), with fallback."""
    try:
        info = pltpu.get_tpu_info()
        cap = int(getattr(info, "vmem_capacity_bytes", 0) or 0)
        if cap > 0:
            return max(32 * 1024 * 1024, min(cap - 8 * 1024 * 1024, 112 * 1024 * 1024))
    except Exception:
        pass
    return 64 * 1024 * 1024


def _weight_spec(shape, single_buffer):
    """Constant-index operand; single-buffered when supported (index never changes)."""
    n = len(shape)
    index_map = lambda *_: (0,) * n
    if single_buffer:
        try:
            return pl.BlockSpec(shape, index_map, pipeline_mode=pl.Buffered(1))
        except TypeError:
            pass
    return pl.BlockSpec(shape, index_map)


def _block_forward_impl(x, kparams, n_head, *, q_block, compute_dtype,
                        vmem_limit_bytes, single_buffer_weights):
    B, T, C = x.shape
    H = n_head
    assert C % H == 0
    Dh = C // H
    assert T % q_block == 0, "q_block must divide T"
    n_q = T // q_block
    cdt = compute_dtype

    # ---- pass 1: LN1 + fused QKV, head-major outputs (B, H, T, Dh) ----
    qkv_out_shape = tuple(jax.ShapeDtypeStruct((B, H, T, Dh), cdt) for _ in range(3))
    hm_out_spec = pl.BlockSpec((1, H, q_block, Dh), lambda b, r: (b, 0, r, 0))
    q_hm, k_hm, v_hm = pl.pallas_call(
        functools.partial(qkv_kernel, n_head=H, compute_dtype=cdt),
        out_shape=qkv_out_shape,
        grid_spec=pltpu.PrefetchScalarGridSpec(
            num_scalar_prefetch=0,
            grid=(B, n_q),
            in_specs=[
                pl.BlockSpec((1, q_block, C), lambda b, r: (b, r, 0)),
                _weight_spec((1, C), single_buffer_weights),
                _weight_spec((1, C), single_buffer_weights),
                _weight_spec((C, 3 * C), single_buffer_weights),
                _weight_spec((1, 3 * C), single_buffer_weights),
            ],
            out_specs=[hm_out_spec, hm_out_spec, hm_out_spec],
        ),
        compiler_params=pltpu.CompilerParams(
            dimension_semantics=("parallel", "parallel"),
            vmem_limit_bytes=vmem_limit_bytes,
        ),
    )(x, kparams['ln1_g'], kparams['ln1_b'], kparams['w_qkv'], kparams['b_qkv'])

    # ---- pass 2: causal flash attention + out-proj + LN2 + FFN + residuals ----
    n_k = n_q  # TQ == TK == q_block
    # Clamp the key-tile index to the causal frontier: skipped tiles keep the same
    # block index as the previous step, so no redundant K/V DMA is issued.
    kv_map = lambda b, q, k: (b, 0, jnp.minimum(k, q), 0)
    out = pl.pallas_call(
        functools.partial(attn_ffn_kernel, compute_dtype=cdt),
        out_shape=jax.ShapeDtypeStruct((B, T, C), jnp.float32),
        grid_spec=pltpu.PrefetchScalarGridSpec(
            num_scalar_prefetch=0,
            grid=(B, n_q, n_k),
            in_specs=[
                pl.BlockSpec((1, q_block, C), lambda b, q, k: (b, q, 0)),          # x tile
                pl.BlockSpec((1, H, q_block, Dh), lambda b, q, k: (b, 0, q, 0)),   # Q
                pl.BlockSpec((1, H, q_block, Dh), kv_map),                         # K
                pl.BlockSpec((1, H, q_block, Dh), kv_map),                         # V
                _weight_spec((1, C), single_buffer_weights),       # ln2 gamma
                _weight_spec((1, C), single_buffer_weights),       # ln2 beta
                _weight_spec((C, C), single_buffer_weights),       # W_o
                _weight_spec((1, C), single_buffer_weights),       # b_o
                _weight_spec((C, 4 * C), single_buffer_weights),   # W1
                _weight_spec((1, 4 * C), single_buffer_weights),   # b1
                _weight_spec((4 * C, C), single_buffer_weights),   # W2
                _weight_spec((1, C), single_buffer_weights),       # b2
            ],
            out_specs=pl.BlockSpec((1, q_block, C), lambda b, q, k: (b, q, 0)),
            scratch_shapes=[
                pltpu.VMEM((H, q_block, 1), jnp.float32),    # running max
                pltpu.VMEM((H, q_block, 1), jnp.float32),    # running denom
                pltpu.VMEM((H, q_block, Dh), jnp.float32),   # running context acc
            ],
        ),
        compiler_params=pltpu.CompilerParams(
            dimension_semantics=("parallel", "parallel", "arbitrary"),
            vmem_limit_bytes=vmem_limit_bytes,
        ),
    )(x, q_hm, k_hm, v_hm,
      kparams['ln2_g'], kparams['ln2_b'],
      kparams['w_o'], kparams['b_o'],
      kparams['w1'], kparams['b1'],
      kparams['w2'], kparams['b2'])
    return out


def block_forward(x, kparams, n_head, *, q_block=None, compute_dtype=jnp.float32,
                  vmem_limit_bytes=None):
    B, T, C = x.shape
    if q_block is None:
        q_block = min(T, 128)   # 128 matches v5e MXU; pass 256 on v6e/v7x when T allows
    if vmem_limit_bytes is None:
        vmem_limit_bytes = _default_vmem_limit()
    try:
        return _block_forward_impl(x, kparams, n_head, q_block=q_block,
                                   compute_dtype=compute_dtype,
                                   vmem_limit_bytes=vmem_limit_bytes,
                                   single_buffer_weights=True)
    except Exception:
        # Fallback for Pallas versions that reject single-buffered (Buffered(1)) specs.
        return _block_forward_impl(x, kparams, n_head, q_block=q_block,
                                   compute_dtype=compute_dtype,
                                   vmem_limit_bytes=vmem_limit_bytes,
                                   single_buffer_weights=False)


# ---------------------------------------------------------------------------
# Pure-JAX reference (PyTorch Block forward, eval mode)
# ---------------------------------------------------------------------------
def reference_block(x, params, n_head):
    B, T, C = x.shape
    Dh = C // n_head

    def ln(z, g, b, eps=1e-5):
        mu = jnp.mean(z, axis=-1, keepdims=True)
        var = jnp.mean((z - mu) ** 2, axis=-1, keepdims=True)
        return (z - mu) * jax.lax.rsqrt(var + eps) * g + b

    nx = ln(x, params['ln1_g'][0], params['ln1_b'][0])
    q = nx @ params['wq'].T + params['bq'][0]
    k = nx @ params['wk'].T + params['bk'][0]
    v = nx @ params['wv'].T + params['bv'][0]
    q = q.reshape(B, T, n_head, Dh).transpose(0, 2, 1, 3) / jnp.sqrt(Dh)
    k = k.reshape(B, T, n_head, Dh).transpose(0, 2, 1, 3)
    v = v.reshape(B, T, n_head, Dh).transpose(0, 2, 1, 3)
    s = jnp.einsum('bhqd,bhkd->bhqk', q, k)
    causal = jnp.tril(jnp.ones((T, T), bool))
    s = jnp.where(causal[None, None], s, -jnp.inf)
    p = jax.nn.softmax(s, axis=-1)
    o = jnp.einsum('bhqk,bhkd->bhqd', p, v).transpose(0, 2, 1, 3).reshape(B, T, C)
    sa_out = o @ params['wo'].T + params['bo'][0]
    x = x + sa_out
    nx2 = ln(x, params['ln2_g'][0], params['ln2_b'][0])
    h1 = jax.nn.relu(nx2 @ params['w1'].T + params['b1'][0])
    ff = h1 @ params['w2'].T + params['b2'][0]
    return x + ff


if __name__ == "__main__":
    # Force precise f32 matmuls in both kernel and reference so the f32 check is tight.
    jax.config.update("jax_default_matmul_precision", "highest")

    # NOTE: toy shapes (C=32, Dh=8) underfill the (8,128) vreg / MXU; real speed
    # needs C, Dh at multiples of 128. Kept small to match the module spec.
    B, T, C, H = 2, 8, 32, 4
    root = jax.random.PRNGKey(0)
    kx, kp, kx2 = jax.random.split(root, 3)
    x = jax.random.normal(kx, (B, T, C), jnp.float32)
    params = make_block_params(kp, C)

    # ---- exact f32 path (single query/key tile) ----
    kp_f32 = prepare_params(params, jnp.float32)
    out = block_forward(x, kp_f32, H, compute_dtype=jnp.float32)
    jax.block_until_ready(out)
    ref = reference_block(x, params, H)
    assert out.shape == (B, T, C)
    assert jnp.allclose(out, ref, atol=2e-3, rtol=2e-3), "f32 mismatch vs JAX reference"

    # ---- bf16-matmul path exercising the multi-tile causal flash loop ----
    T2 = 16
    x2 = jax.random.normal(kx2, (B, T2, C), jnp.float32)
    kp_bf16 = prepare_params(params, jnp.bfloat16)
    out2 = block_forward(x2, kp_bf16, H, q_block=8, compute_dtype=jnp.bfloat16)
    jax.block_until_ready(out2)
    ref2 = reference_block(x2, params, H)
    assert out2.shape == (B, T2, C)
    assert jnp.allclose(out2, ref2, atol=5e-2, rtol=5e-2), "bf16 mismatch vs JAX reference"

    print("KERNEL_OK")
</pallas_src>

<mosaic_0001>
module attributes {stable_mosaic.version = 11 : i64} {
  func.func @qkv_kernel(%arg0: i32, %arg1: i32, %arg2: memref<1x8x32xf32, #tpu.memory_space<vmem>>, %arg3: memref<1x32xf32, #tpu.memory_space<vmem>>, %arg4: memref<1x32xf32, #tpu.memory_space<vmem>>, %arg5: memref<32x96xf32, #tpu.memory_space<vmem>>, %arg6: memref<1x96xf32, #tpu.memory_space<vmem>>, %arg7: memref<1x4x8x8xf32, #tpu.memory_space<vmem>>, %arg8: memref<1x4x8x8xf32, #tpu.memory_space<vmem>>, %arg9: memref<1x4x8x8xf32, #tpu.memory_space<vmem>>) attributes {dimension_semantics = [#tpu.dimension_semantics<parallel>, #tpu.dimension_semantics<parallel>], iteration_bounds = array<i64: 2, 1>, scalar_prefetch = 0 : i64, scratch_operands = 0 : i64, tpu.core_type = #tpu.core_type<tc>, window_params = [{transform_indices = @transform_0, window_bounds = array<i64: 1, 8, 32>}, {pipeline_mode = #tpu.pipeline_mode<synchronous>, transform_indices = @transform_1, window_bounds = array<i64: 1, 32>}, {pipeline_mode = #tpu.pipeline_mode<synchronous>, transform_indices = @transform_2, window_bounds = array<i64: 1, 32>}, {pipeline_mode = #tpu.pipeline_mode<synchronous>, transform_indices = @transform_3, window_bounds = array<i64: 32, 96>}, {pipeline_mode = #tpu.pipeline_mode<synchronous>, transform_indices = @transform_4, window_bounds = array<i64: 1, 96>}, {transform_indices = @transform_5, window_bounds = array<i64: 1, 4, 8, 8>}, {transform_indices = @transform_6, window_bounds = array<i64: 1, 4, 8, 8>}, {transform_indices = @transform_7, window_bounds = array<i64: 1, 4, 8, 8>}]} {
    %c0 = arith.constant 0 : index
    %c0_0 = arith.constant 0 : index
    %c0_1 = arith.constant 0 : index
    %0 = vector.load %arg2[%c0, %c0_0, %c0_1] : memref<1x8x32xf32, #tpu.memory_space<vmem>>, vector<1x8x32xf32>
    %1 = vector.shape_cast %0 : vector<1x8x32xf32> to vector<8x32xf32>
    %c0_2 = arith.constant 0 : index
    %c0_3 = arith.constant 0 : index
    %2 = vector.load %arg3[%c0_2, %c0_3] : memref<1x32xf32, #tpu.memory_space<vmem>>, vector<1x32xf32>
    %3 = vector.shape_cast %2 : vector<1x32xf32> to vector<32xf32>
    %c0_4 = arith.constant 0 : index
    %c0_5 = arith.constant 0 : index
    %4 = vector.load %arg4[%c0_4, %c0_5] : memref<1x32xf32, #tpu.memory_space<vmem>>, vector<1x32xf32>
    %5 = vector.shape_cast %4 : vector<1x32xf32> to vector<32xf32>
    %cst = arith.constant dense<0.000000e+00> : vector<8xf32>
    %6 = vector.multi_reduction <add>, %1, %cst [1] : vector<8x32xf32> to vector<8xf32>
    %7 = vector.shape_cast %6 : vector<8xf32> to vector<8x1xf32>
    %cst_6 = arith.constant 3.200000e+01 : f32
    %8 = vector.broadcast %cst_6 : f32 to vector<8x1xf32>
    %9 = arith.divf %7, %8 : vector<8x1xf32>
    %10 = vector.broadcast %9 : vector<8x1xf32> to vector<8x32xf32>
    %11 = arith.subf %1, %10 : vector<8x32xf32>
    %12 = arith.mulf %11, %11 : vector<8x32xf32>
    %cst_7 = arith.constant dense<0.000000e+00> : vector<8xf32>
    %13 = vector.multi_reduction <add>, %12, %cst_7 [1] : vector<8x32xf32> to vector<8xf32>
    %14 = vector.shape_cast %13 : vector<8xf32> to vector<8x1xf32>
    %cst_8 = arith.constant 3.200000e+01 : f32
    %15 = vector.broadcast %cst_8 : f32 to vector<8x1xf32>
    %16 = arith.divf %14, %15 : vector<8x1xf32>
    %17 = vector.broadcast %9 : vector<8x1xf32> to vector<8x32xf32>
    %18 = arith.subf %1, %17 : vector<8x32xf32>
    %cst_9 = arith.constant 9.99999974E-6 : f32
    %19 = vector.broadcast %cst_9 : f32 to vector<8x1xf32>
    %20 = arith.addf %16, %19 : vector<8x1xf32>
    %21 = math.rsqrt %20 : vector<8x1xf32>
    %22 = vector.broadcast %21 : vector<8x1xf32> to vector<8x32xf32>
    %23 = arith.mulf %18, %22 : vector<8x32xf32>
    %24 = vector.shape_cast %3 : vector<32xf32> to vector<1x32xf32>
    %25 = vector.broadcast %24 : vector<1x32xf32> to vector<8x32xf32>
    %26 = arith.mulf %23, %25 : vector<8x32xf32>
    %27 = vector.shape_cast %5 : vector<32xf32> to vector<1x32xf32>
    %28 = vector.broadcast %27 : vector<1x32xf32> to vector<8x32xf32>
    %29 = arith.addf %26, %28 : vector<8x32xf32>
    %c0_10 = arith.constant 0 : index
    %c0_11 = arith.constant 0 : index
    %30 = vector.load %arg5[%c0_10, %c0_11] : memref<32x96xf32, #tpu.memory_space<vmem>>, vector<32x96xf32>
    %cst_12 = arith.constant dense<0.000000e+00> : vector<8x96xf32>
    %31 = tpu.matmul %29, %30, %cst_12 {dimension_numbers = #tpu.dot_dimension_numbers<[1], [0], [0], [1], [0, 0, 1, 1], [], []>, precision = #tpu.contract_precision<fp32>} : vector<8x32xf32>, vector<32x96xf32>, vector<8x96xf32> -> vector<8x96xf32>
    %c0_13 = arith.constant 0 : index
    %c0_14 = arith.constant 0 : index
    %32 = vector.load %arg6[%c0_13, %c0_14] : memref<1x96xf32, #tpu.memory_space<vmem>>, vector<1x96xf32>
    %33 = vector.shape_cast %32 : vector<1x96xf32> to vector<96xf32>
    %34 = vector.shape_cast %33 : vector<96xf32> to vector<1x96xf32>
    %35 = vector.broadcast %34 : vector<1x96xf32> to vector<8x96xf32>
    %36 = arith.addf %31, %35 : vector<8x96xf32>
    %37 = vector.extract_strided_slice %36 {offsets = [0, 0], sizes = [8, 32], strides = [1, 1]} : vector<8x96xf32> to vector<8x32xf32>
    %cst_15 = arith.constant 0.353553385 : f32
    %38 = vector.broadcast %cst_15 : f32 to vector<8x32xf32>
    %39 = arith.mulf %37, %38 : vector<8x32xf32>
    %40 = vector.shape_cast %39 : vector<8x32xf32> to vector<8x4x8xf32>
    %41 = tpu.transpose %40, [1, 0, 2] : vector<8x4x8xf32> -> vector<4x8x8xf32>
    %c0_16 = arith.constant 0 : index
    %c0_17 = arith.constant 0 : index
    %c0_18 = arith.constant 0 : index
    %c0_19 = arith.constant 0 : index
    %42 = vector.load %arg7[%c0_16, %c0_17, %c0_18, %c0_19] : memref<1x4x8x8xf32, #tpu.memory_space<vmem>>, vector<1x4x8x8xf32>
    %43 = vector.shape_cast %42 : vector<1x4x8x8xf32> to vector<4x8x8xf32>
    %44 = vector.shape_cast %41 : vector<4x8x8xf32> to vector<1x4x8x8xf32>
    tpu.vector_store %arg7[%c0_16, %c0_17, %c0_18, %c0_19], %44 {strides = array<i32>} : memref<1x4x8x8xf32, #tpu.memory_space<vmem>>, vector<1x4x8x8xf32>,
    %45 = vector.extract_strided_slice %36 {offsets = [0, 32], sizes = [8, 32], strides = [1, 1]} : vector<8x96xf32> to vector<8x32xf32>
    %46 = vector.shape_cast %45 : vector<8x32xf32> to vector<8x4x8xf32>
    %47 = tpu.transpose %46, [1, 0, 2] : vector<8x4x8xf32> -> vector<4x8x8xf32>
    %c0_20 = arith.constant 0 : index
    %c0_21 = arith.constant 0 : index
    %c0_22 = arith.constant 0 : index
    %c0_23 = arith.constant 0 : index
    %48 = vector.load %arg8[%c0_20, %c0_21, %c0_22, %c0_23] : memref<1x4x8x8xf32, #tpu.memory_space<vmem>>, vector<1x4x8x8xf32>
    %49 = vector.shape_cast %48 : vector<1x4x8x8xf32> to vector<4x8x8xf32>
    %50 = vector.shape_cast %47 : vector<4x8x8xf32> to vector<1x4x8x8xf32>
    tpu.vector_store %arg8[%c0_20, %c0_21, %c0_22, %c0_23], %50 {strides = array<i32>} : memref<1x4x8x8xf32, #tpu.memory_space<vmem>>, vector<1x4x8x8xf32>,
    %51 = vector.extract_strided_slice %36 {offsets = [0, 64], sizes = [8, 32], strides = [1, 1]} : vector<8x96xf32> to vector<8x32xf32>
    %52 = vector.shape_cast %51 : vector<8x32xf32> to vector<8x4x8xf32>
    %53 = tpu.transpose %52, [1, 0, 2] : vector<8x4x8xf32> -> vector<4x8x8xf32>
    %c0_24 = arith.constant 0 : index
    %c0_25 = arith.constant 0 : index
    %c0_26 = arith.constant 0 : index
    %c0_27 = arith.constant 0 : index
    %54 = vector.load %arg9[%c0_24, %c0_25, %c0_26, %c0_27] : memref<1x4x8x8xf32, #tpu.memory_space<vmem>>, vector<1x4x8x8xf32>
    %55 = vector.shape_cast %54 : vector<1x4x8x8xf32> to vector<4x8x8xf32>
    %56 = vector.shape_cast %53 : vector<4x8x8xf32> to vector<1x4x8x8xf32>
    tpu.vector_store %arg9[%c0_24, %c0_25, %c0_26, %c0_27], %56 {strides = array<i32>} : memref<1x4x8x8xf32, #tpu.memory_space<vmem>>, vector<1x4x8x8xf32>,
    return
  }
  func.func @transform_0(%arg0: i32, %arg1: i32) -> (i32, i32, i32) {
    %c0_i32 = arith.constant 0 : i32
    %c0_i32_0 = arith.constant 0 : i32
    return %arg0, %arg1, %c0_i32 : i32, i32, i32
  }
  func.func @transform_1(%arg0: i32, %arg1: i32) -> (i32, i32) {
    %c0_i32 = arith.constant 0 : i32
    %c0_i32_0 = arith.constant 0 : i32
    %c0_i32_1 = arith.constant 0 : i32
    return %c0_i32, %c0_i32_0 : i32, i32
  }
  func.func @transform_2(%arg0: i32, %arg1: i32) -> (i32, i32) {
    %c0_i32 = arith.constant 0 : i32
    %c0_i32_0 = arith.constant 0 : i32
    %c0_i32_1 = arith.constant 0 : i32
    return %c0_i32, %c0_i32_0 : i32, i32
  }
  func.func @transform_3(%arg0: i32, %arg1: i32) -> (i32, i32) {
    %c0_i32 = arith.constant 0 : i32
    %c0_i32_0 = arith.constant 0 : i32
    %c0_i32_1 = arith.constant 0 : i32
    return %c0_i32, %c0_i32_0 : i32, i32
  }
  func.func @transform_4(%arg0: i32, %arg1: i32) -> (i32, i32) {
    %c0_i32 = arith.constant 0 : i32
    %c0_i32_0 = arith.constant 0 : i32
    %c0_i32_1 = arith.constant 0 : i32
    return %c0_i32, %c0_i32_0 : i32, i32
  }
  func.func @transform_5(%arg0: i32, %arg1: i32) -> (i32, i32, i32, i32) {
    %c0_i32 = arith.constant 0 : i32
    %c0_i32_0 = arith.constant 0 : i32
    %c0_i32_1 = arith.constant 0 : i32
    return %arg0, %c0_i32, %arg1, %c0_i32_0 : i32, i32, i32, i32
  }
  func.func @transform_6(%arg0: i32, %arg1: i32) -> (i32, i32, i32, i32) {
    %c0_i32 = arith.constant 0 : i32
    %c0_i32_0 = arith.constant 0 : i32
    %c0_i32_1 = arith.constant 0 : i32
    return %arg0, %c0_i32, %arg1, %c0_i32_0 : i32, i32, i32, i32
  }
  func.func @transform_7(%arg0: i32, %arg1: i32) -> (i32, i32, i32, i32) {
    %c0_i32 = arith.constant 0 : i32
    %c0_i32_0 = arith.constant 0 : i32
    %c0_i32_1 = arith.constant 0 : i32
    return %arg0, %c0_i32, %arg1, %c0_i32_0 : i32, i32, i32, i32
  }
}

module attributes {stable_mosaic.version = 11 : i64} {
  func.func @qkv_kernel(%arg0: i32, %arg1: i32, %arg2: memref<1x8x32xf32, #tpu.memory_space<vmem>>, %arg3: memref<1x32xf32, #tpu.memory_space<vmem>>, %arg4: memref<1x32xf32, #tpu.memory_space<vmem>>, %arg5: memref<32x96xf32, #tpu.memory_space<vmem>>, %arg6: memref<1x96xf32, #tpu.memory_space<vmem>>, %arg7: memref<1x4x8x8xf32, #tpu.memory_space<vmem>>, %arg8: memref<1x4x8x8xf32, #tpu.memory_space<vmem>>, %arg9: memref<1x4x8x8xf32, #tpu.memory_space<vmem>>) attributes {dimension_semantics = [#tpu.dimension_semantics<parallel>, #tpu.dimension_semantics<parallel>], iteration_bounds = array<i64: 2, 1>, scalar_prefetch = 0 : i64, scratch_operands = 0 : i64, tpu.core_type = #tpu.core_type<tc>, window_params = [{transform_indices = @transform_0, window_bounds = array<i64: 1, 8, 32>}, {pipeline_mode = #tpu.pipeline_mode<synchronous>, transform_indices = @transform_1, window_bounds = array<i64: 1, 32>}, {pipeline_mode = #tpu.pipeline_mode<synchronous>, transform_indices = @transform_2, window_bounds = array<i64: 1, 32>}, {pipeline_mode = #tpu.pipeline_mode<synchronous>, transform_indices = @transform_3, window_bounds = array<i64: 32, 96>}, {pipeline_mode = #tpu.pipeline_mode<synchronous>, transform_indices = @transform_4, window_bounds = array<i64: 1, 96>}, {transform_indices = @transform_5, window_bounds = array<i64: 1, 4, 8, 8>}, {transform_indices = @transform_6, window_bounds = array<i64: 1, 4, 8, 8>}, {transform_indices = @transform_7, window_bounds = array<i64: 1, 4, 8, 8>}]} {
    %c0 = arith.constant 0 : index
    %c0_0 = arith.constant 0 : index
    %c0_1 = arith.constant 0 : index
    %0 = vector.load %arg2[%c0, %c0_0, %c0_1] : memref<1x8x32xf32, #tpu.memory_space<vmem>>, vector<1x8x32xf32>
    %1 = vector.shape_cast %0 : vector<1x8x32xf32> to vector<8x32xf32>
    %c0_2 = arith.constant 0 : index
    %c0_3 = arith.constant 0 : index
    %2 = vector.load %arg3[%c0_2, %c0_3] : memref<1x32xf32, #tpu.memory_space<vmem>>, vector<1x32xf32>
    %3 = vector.shape_cast %2 : vector<1x32xf32> to vector<32xf32>
    %c0_4 = arith.constant 0 : index
    %c0_5 = arith.constant 0 : index
    %4 = vector.load %arg4[%c0_4, %c0_5] : memref<1x32xf32, #tpu.memory_space<vmem>>, vector<1x32xf32>
    %5 = vector.shape_cast %4 : vector<1x32xf32> to vector<32xf32>
    %cst = arith.constant dense<0.000000e+00> : vector<8xf32>
    %6 = vector.multi_reduction <add>, %1, %cst [1] : vector<8x32xf32> to vector<8xf32>
    %7 = vector.shape_cast %6 : vector<8xf32> to vector<8x1xf32>
    %cst_6 = arith.constant 3.200000e+01 : f32
    %8 = vector.broadcast %cst_6 : f32 to vector<8x1xf32>
    %9 = arith.divf %7, %8 : vector<8x1xf32>
    %10 = vector.broadcast %9 : vector<8x1xf32> to vector<8x32xf32>
    %11 = arith.subf %1, %10 : vector<8x32xf32>
    %12 = arith.mulf %11, %11 : vector<8x32xf32>
    %cst_7 = arith.constant dense<0.000000e+00> : vector<8xf32>
    %13 = vector.multi_reduction <add>, %12, %cst_7 [1] : vector<8x32xf32> to vector<8xf32>
    %14 = vector.shape_cast %13 : vector<8xf32> to vector<8x1xf32>
    %cst_8 = arith.constant 3.200000e+01 : f32
    %15 = vector.broadcast %cst_8 : f32 to vector<8x1xf32>
    %16 = arith.divf %14, %15 : vector<8x1xf32>
    %17 = vector.broadcast %9 : vector<8x1xf32> to vector<8x32xf32>
    %18 = arith.subf %1, %17 : vector<8x32xf32>
    %cst_9 = arith.constant 9.99999974E-6 : f32
    %19 = vector.broadcast %cst_9 : f32 to vector<8x1xf32>
    %20 = arith.addf %16, %19 : vector<8x1xf32>
    %21 = math.rsqrt %20 : vector<8x1xf32>
    %22 = vector.broadcast %21 : vector<8x1xf32> to vector<8x32xf32>
    %23 = arith.mulf %18, %22 : vector<8x32xf32>
    %24 = vector.shape_cast %3 : vector<32xf32> to vector<1x32xf32>
    %25 = vector.broadcast %24 : vector<1x32xf32> to vector<8x32xf32>
    %26 = arith.mulf %23, %25 : vector<8x32xf32>
    %27 = vector.shape_cast %5 : vector<32xf32> to vector<1x32xf32>
    %28 = vector.broadcast %27 : vector<1x32xf32> to vector<8x32xf32>
    %29 = arith.addf %26, %28 : vector<8x32xf32>
    %c0_10 = arith.constant 0 : index
    %c0_11 = arith.constant 0 : index
    %30 = vector.load %arg5[%c0_10, %c0_11] : memref<32x96xf32, #tpu.memory_space<vmem>>, vector<32x96xf32>
    %cst_12 = arith.constant dense<0.000000e+00> : vector<8x96xf32>
    %31 = tpu.matmul %29, %30, %cst_12 {dimension_numbers = #tpu.dot_dimension_numbers<[1], [0], [0], [1], [0, 0, 1, 1], [], []>, precision = #tpu.contract_precision<fp32>} : vector<8x32xf32>, vector<32x96xf32>, vector<8x96xf32> -> vector<8x96xf32>
    %c0_13 = arith.constant 0 : index
    %c0_14 = arith.constant 0 : index
    %32 = vector.load %arg6[%c0_13, %c0_14] : memref<1x96xf32, #tpu.memory_space<vmem>>, vector<1x96xf32>
    %33 = vector.shape_cast %32 : vector<1x96xf32> to vector<96xf32>
    %34 = vector.shape_cast %33 : vector<96xf32> to vector<1x96xf32>
    %35 = vector.broadcast %34 : vector<1x96xf32> to vector<8x96xf32>
    %36 = arith.addf %31, %35 : vector<8x96xf32>
    %37 = vector.extract_strided_slice %36 {offsets = [0, 0], sizes = [8, 32], strides = [1, 1]} : vector<8x96xf32> to vector<8x32xf32>
    %cst_15 = arith.constant 0.353553385 : f32
    %38 = vector.broadcast %cst_15 : f32 to vector<8x32xf32>
    %39 = arith.mulf %37, %38 : vector<8x32xf32>
    %40 = vector.shape_cast %39 : vector<8x32xf32> to vector<8x4x8xf32>
    %41 = tpu.transpose %40, [1, 0, 2] : vector<8x4x8xf32> -> vector<4x8x8xf32>
    %c0_16 = arith.constant 0 : index
    %c0_17 = arith.constant 0 : index
    %c0_18 = arith.constant 0 : index
    %c0_19 = arith.constant 0 : index
    %42 = vector.load %arg7[%c0_16, %c0_17, %c0_18, %c0_19] : memref<1x4x8x8xf32, #tpu.memory_space<vmem>>, vector<1x4x8x8xf32>
    %43 = vector.shape_cast %42 : vector<1x4x8x8xf32> to vector<4x8x8xf32>
    %44 = vector.shape_cast %41 : vector<4x8x8xf32> to vector<1x4x8x8xf32>
    tpu.vector_store %arg7[%c0_16, %c0_17, %c0_18, %c0_19], %44 {strides = array<i32>} : memref<1x4x8x8xf32, #tpu.memory_space<vmem>>, vector<1x4x8x8xf32>,
    %45 = vector.extract_strided_slice %36 {offsets = [0, 32], sizes = [8, 32], strides = [1, 1]} : vector<8x96xf32> to vector<8x32xf32>
    %46 = vector.shape_cast %45 : vector<8x32xf32> to vector<8x4x8xf32>
    %47 = tpu.transpose %46, [1, 0, 2] : vector<8x4x8xf32> -> vector<4x8x8xf32>
    %c0_20 = arith.constant 0 : index
    %c0_21 = arith.constant 0 : index
    %c0_22 = arith.constant 0 : index
    %c0_23 = arith.constant 0 : index
    %48 = vector.load %arg8[%c0_20, %c0_21, %c0_22, %c0_23] : memref<1x4x8x8xf32, #tpu.memory_space<vmem>>, vector<1x4x8x8xf32>
    %49 = vector.shape_cast %48 : vector<1x4x8x8xf32> to vector<4x8x8xf32>
    %50 = vector.shape_cast %47 : vector<4x8x8xf32> to vector<1x4x8x8xf32>
    tpu.vector_store %arg8[%c0_20, %c0_21, %c0_22, %c0_23], %50 {strides = array<i32>} : memref<1x4x8x8xf32, #tpu.memory_space<vmem>>, vector<1x4x8x8xf32>,
    %51 = vector.extract_strided_slice %36 {offsets = [0, 64], sizes = [8, 32], strides = [1, 1]} : vector<8x96xf32> to vector<8x32xf32>
    %52 = vector.shape_cast %51 : vector<8x32xf32> to vector<8x4x8xf32>
    %53 = tpu.transpose %52, [1, 0, 2] : vector<8x4x8xf32> -> vector<4x8x8xf32>
    %c0_24 = arith.constant 0 : index
    %c0_25 = arith.constant 0 : index
    %c0_26 = arith.constant 0 : index
    %c0_27 = arith.constant 0 : index
    %54 = vector.load %arg9[%c0_24, %c0_25, %c0_26, %c0_27] : memref<1x4x8x8xf32, #tpu.memory_space<vmem>>, vector<1x4x8x8xf32>
    %55 = vector.shape_cast %54 : vector<1x4x8x8xf32> to vector<4x8x8xf32>
    %56 = vector.shape_cast %53 : vector<4x8x8xf32> to vector<1x4x8x8xf32>
    tpu.vector_store %arg9[%c0_24, %c0_25, %c0_26, %c0_27], %56 {strides = array<i32>} : memref<1x4x8x8xf32, #tpu.memory_space<vmem>>, vector<1x4x8x8xf32>,
    return
  }
  func.func @transform_0(%arg0: i32, %arg1: i32) -> (i32, i32, i32) {
    %c0_i32 = arith.constant 0 : i32
    %c0_i32_0 = arith.constant 0 : i32
    return %arg0, %arg1, %c0_i32 : i32, i32, i32
  }
  func.func @transform_1(%arg0: i32, %arg1: i32) -> (i32, i32) {
    %c0_i32 = arith.constant 0 : i32
    %c0_i32_0 = arith.constant 0 : i32
    %c0_i32_1 = arith.constant 0 : i32
    return %c0_i32, %c0_i32_0 : i32, i32
  }
  func.func @transform_2(%arg0: i32, %arg1: i32) -> (i32, i32) {
    %c0_i32 = arith.constant 0 : i32
    %c0_i32_0 = arith.constant 0 : i32
    %c0_i32_1 = arith.constant 0 : i32
    return %c0_i32, %c0_i32_0 : i32, i32
  }
  func.func @transform_3(%arg0: i32, %arg1: i32) -> (i32, i32) {
    %c0_i32 = arith.constant 0 : i32
    %c0_i32_0 = arith.constant 0 : i32
    %c0_i32_1 = arith.constant 0 : i32
    return %c0_i32, %c0_i32_0 : i32, i32
  }
  func.func @transform_4(%arg0: i32, %arg1: i32) -> (i32, i32) {
    %c0_i32 = arith.constant 0 : i32
    %c0_i32_0 = arith.constant 0 : i32
    %c0_i32_1 = arith.constant 0 : i32
    return %c0_i32, %c0_i32_0 : i32, i32
  }
  func.func @transform_5(%arg0: i32, %arg1: i32) -> (i32, i32, i32, i32) {
    %c0_i32 = arith.constant 0 : i32
    %c0_i32_0 = arith.constant 0 : i32
    %c0_i32_1 = arith.constant 0 : i32
    return %arg0, %c0_i32, %arg1, %c0_i32_0 : i32, i32, i32, i32
  }
  func.func @transform_6(%arg0: i32, %arg1: i32) -> (i32, i32, i32, i32) {
    %c0_i32 = arith.constant 0 : i32
    %c0_i32_0 = arith.constant 0 : i32
    %c0_i32_1 = arith.constant 0 : i32
    return %arg0, %c0_i32, %arg1, %c0_i32_0 : i32, i32, i32, i32
  }
  func.func @transform_7(%arg0: i32, %arg1: i32) -> (i32, i32, i32, i32) {
    %c0_i32 = arith.constant 0 : i32
    %c0_i32_0 = arith.constant 0 : i32
    %c0_i32_1 = arith.constant 0 : i32
    return %arg0, %c0_i32, %arg1, %c0_i32_0 : i32, i32, i32, i32
  }
}

</mosaic_0001>

<bundles_post_ra>
// kernel: tpu_custom_call.1
= control target key start
LH: loop header
LB: loop body
LE: loop exit
PB: predicated region body
PF: predicated region fallthrough
CT: control target
= control target key end

     0   :  { %s2053_s0 = inlined_call_operand.hbm [shape: f32[2,8,32], index: 0, kind: input, shape index: {}]   ;;  %s2054_s1 = inlined_call_operand.hbm [shape: f32[1,32], index: 1, kind: input, shape index: {}]   ;;  %s2055_s2 = inlined_call_operand.vmem [shape: f32[1,32], index: 2, kind: input, shape index: {}]   ;;  %s2056_s3 = inlined_call_operand.hbm [shape: f32[32,96], index: 3, kind: input, shape index: {}]   ;;  %s2057_s4 = inlined_call_operand.vmem [shape: f32[1,96], index: 4, kind: input, shape index: {}]   ;;  %s2058_s5 = inlined_call_operand.hbm [shape: f32[2,4,8,8], index: 5, kind: output, shape index: {0}]   ;;  %s2059_s6 = inlined_call_operand.hbm [shape: f32[2,4,8,8], index: 6, kind: output, shape index: {1}]   ;;  %s2060_s7 = inlined_call_operand.hbm [shape: f32[2,4,8,8], index: 7, kind: output, shape index: {2}]  }
   0x1   :  { %2062 = sst [smem:[#allocation16_spill]] %s2054_s1 }
   0x2   :  { %2063 = sst [smem:[#allocation17_spill]] %s2056_s3 }
   0x3   :  { %13 = vsyncpa [#allocation3], 0 }
   0x4   :  { %15 = vsyncpa [#allocation3 + $0x1], 0 }
   0x5   :  { %16 = vsyncpa [#allocation6], 0 }
   0x6   :  { %17 = vsyncpa [#allocation4], 0 }
   0x7   :  { %19 = vsyncpa [#allocation4 + $0x1], 0 }
   0x8   :  { %20 = vsyncpa [#allocation10], 0 }
   0x9   :  { %22 = vsyncpa [#allocation10 + $0x1], 0  ;;  %s1655_s24 = smov 0   ;;  %s1657_s25 = smov 0  }
   0xa   :  { %s1659_s26 = smov 0   ;;  %s1661_s27 = smov 0  }
   0xb   :  { %s1663_s28 = smov 0   ;;  %s1665_s29 = smov 0  }
   0xc LB: > { %s1686_s30 = sadd.s32 4294967295, %s1599_s29   ;;  %s2061_s8 = sadd.s32 4294967294, %s1599_s29   ;;  %s1599_s29 = sphi %s1665_s29, %s28_s29   ;;  %s1595_s28 = sphi %s1663_s28, %s2075_s28   ;;  %s1591_s27 = sphi %s1661_s27, %s2074_s27   ;;  %s1587_s26 = sphi %s1659_s26, %s2073_s26   ;;  %s1583_s25 = sphi %s1657_s25, %s2072_s25   ;;  %s1579_s24 = sphi %s1655_s24, %s2071_s24  }
   0xd   : > { %p62_p0 = scmp.ne.s32.totalorder %s1583_s25, %s1579_s24  ;;  %p63_p1 = scmp.eq.s32.totalorder %s1686_s30, 0 }
   0xe   : > { %p178_p2 = scmp.eq.s32.totalorder %s2061_s8, 1  ;;  %p1224_p4 = scmp.ge.s32.totalorder %s1599_s29, 1 }
   0xf   : > { %p1696_p3 = por %p63_p1, %p62_p0  ;;  %p241_p6 = scmp.lt.s32.totalorder %s1599_s29, 3 }
  0x10   : > { %p1701_p5 = por %p178_p2, %p62_p0  ;;  %s2066_s1 = sld [smem:[#allocation16_spill]] }
  0x11   : > { %p1709_p7 = pnand %p1224_p4, %p241_p6  ;;  %p1227_p8 = scmp.ge.s32.totalorder %s1599_s29, 2 }
  0x12   : > { %s1601_s15 = smov [#allocation5]   ;;  %s2068_s3 = sld [smem:[#allocation17_spill]] }
  0x13   : > { %p1267_p9 = pneg %p1709_p7  ;;  %s255_s16 = sshll.u32 %s1601_s15, 4  ;;  %s256_s16 = int_to_ptr.vmem [resolvable:$true] %s255_s16 }
  0x14   : > { %s1602_s20 = smov [#allocation7]   ;;  %s1603_s22 = smov 128  }
  0x15   : > { %p1268_p10 = pnand %p1267_p9, %p63_p1  ;;  %s269_s21 = sshll.u32 %s1602_s20, 4  ;;  %s270_s21 = int_to_ptr.vmem [resolvable:$true] %s269_s21 }
  0x16   : > { %s253_s13 = sshll.u32 %s2066_s1, 4  ;;  %s1604_s23 = smov 8   ;;  %s254_s13 = int_to_ptr.hbm [resolvable:$true] %s253_s13 }
  0x17   : > { %1270 = dma.hbm_to_vmem [thread:$0]  (!%p1268_p10), %s254_s13, 16, %s256_s16, [#allocation6]  }
  0x18   : > { %s267_s19 = sshll.u32 %s2068_s3, 4  ;;  %p172_p11 = scmp.eq.s32.totalorder %s1686_s30, 1  ;;  %s268_s19 = int_to_ptr.hbm [resolvable:$true] %s267_s19 }
  0x19   : > { %1273 = dma.hbm_to_vmem [thread:$0]  (!%p1268_p10), %s268_s19, 512, %s270_s21, [#allocation6], %s1603_s22, %s1603_s22, %s1604_s23  }
  0x1a   : > { %s40_s11 = sadd.s32 1, %s1595_s28  ;;  %s49_s12 = sadd.s32 1, %s1587_s26 }
  0x1b   : > { %p42_p12 = scmp.ge.s32.totalorder %s40_s11, 2  ;;  %p56_p13 = scmp.ne.s32.totalorder %s1587_s26, %s1583_s25 }
  0x1c   : > { %p57_p0 = scmp.eq.s32.totalorder %s1599_s29, 0  ;;  %p1290_p4 = scmp.lt.s32.totalorder %s1599_s29, 2 }
  0x1d   : > { %s2077_s11 = smov (%p42_p12, %s40_s11), 0  ;;  %p1729_p2 = por %p172_p11, %p56_p13 }
  0x1e   : > { %s44_s13 = ssub.s32 %s1595_s28, %s2077_s11  ;;  %s286_s16 = sand.u32 1, %s1587_s26  }
  0x1f   : > { %p47_p6 = scmp.eq.s32.totalorder %s44_s13, 0  ;;  %p58_p9 = por %p57_p0, %p56_p13 }
  0x20   : > { %s1228_s17 = sshll.u32 %s286_s16, 3  ;;  %s1229_s18 = sshll.u32 %s1595_s28, 3 }
  0x21   : > { %s1739_s19 = scalar_select %p47_p6, %s1587_s26, %s49_s12  }
  0x22   : > { %s295_s22 = scalar_lea.hbm %s2053_s0, %s1229_s18  ;;  %s290_s8 = scalar_lea.vmem [#allocation2], %s1228_s17 }
  0x23   : > { %s297_s23 = sshll.u32 %s295_s22, 4  ;;  %s299_s1 = sshll.u32 %s290_s8, 4  ;;  %s298_s23 = int_to_ptr.hbm [resolvable:$true] %s297_s23  ;;  %s300_s1 = int_to_ptr.vmem [resolvable:$true] %s299_s1 }
  0x24   : > { %p1275_p10 = pnand %p1290_p4, %p58_p9  ;;  %s287_s3 = scalar_lea.sflag [#allocation3], %s286_s16 }
  0x25   : > { %308 = sbr.rel (%p1709_p7) target bundleno = 760 (0x2f8), region = 40  ;;  %s1749_s12 = sand.u32 (!%p1709_p7), 1, %s1583_s25  }
  0x26   : > { %1277 = dma.hbm_to_vmem [thread:$0]  (!%p1275_p10), %s298_s23, 128, %s300_s1, %s287_s3  }
  0x27   : > { %s1231_s13 = sshll.u32 (!%p1709_p7), %s1749_s12, 3  ;;  %s311_s18 = scalar_lea.sflag (!%p1709_p7), [#allocation3], %s1749_s12 }
  0x28   : > { %s314_s20 = scalar_lea.vmem (!%p1709_p7), [#allocation2], %s1231_s13 }
  0x2a   : > { %1562 = dma.done.wait (%p1696_p3), %s311_s18, 128  }
  0x2b   : > { %1564 = vsyncadd (%p1696_p3), %s311_s18, 4294967168 }
  0x2c   : > { %1566 = dma.done.wait (%p63_p1), [#allocation6], 528  }
  0x2d   : > { %1568 = vsyncadd (%p63_p1), [#allocation6], 4294966768  ;;  %vm369_vm0 = vcmask 261120   ;;  %v366_v0 = vld [vmem:[%s314_s20] sm:$0xff]  ;;  %v1605_v2 = vmov 32.0   ;;  %v407_v23 = vld [vmem:[#allocation7] sm:$0xff] }
  0x2e   : > { %v370_v1 = vsel %vm369_vm0, %v366_v0, 0.0  ;;  %1359 = vrcp.f32 %v1605_v2  ;;  %v410_v14 = vld [vmem:[#allocation7 + $0x18] sm:$0xff]  ;;  %v409_v16 = vld [vmem:[#allocation7 + $0x10] sm:$0xff]  ;;  %v408_v19 = vld [vmem:[#allocation7 + $0x8] sm:$0xff]  ;;  %v436_v27 = vand.u32 4294901760, %v407_v23  ;;  %s1606_s14 = smov 104  }
  0x2f   : > { %371 = vadd.xlane.f32.xlu0 %v370_v1  ;;  %v430_v15 = vand.u32 4294901760, %v410_v14  ;;  %v432_v18 = vand.u32 4294901760, %v409_v16  ;;  %v434_v22 = vand.u32 4294901760, %v408_v19  ;;  %v1356_v47 = vld [vmem:[#allocation5] ss:$0 sm:$0xff]  ;;  %s1607_s16 = smov 112  }
  0x30   : > { %v478_v31 = vsub.f32 %v407_v23, %v436_v27  ;;  %v1357_v50 = vld [vmem:[%s2055_s2] ss:$0 sm:$0xff]  ;;  %s1608_s17 = smov 96   ;;  %s1609_s21 = smov 120   ;;  %vm615_vm5 = vcmask 1047556   ;;  %vm725_vm6 = vcmask 64512  }
  0x31   : > { %v460_v17 = vsub.f32 %v410_v14, %v430_v15  ;;  %531 = vmatpush.msra.mxu3 %v430_v15  ;;  %431 = vmatpush.msra.mxu0 %v430_v15  ;;  %v466_v21 = vsub.f32 %v409_v16, %v432_v18  ;;  %v472_v26 = vsub.f32 %v408_v19, %v434_v22  ;;  %v1358_v59 = vld [vmem:[%s2057_s4] ss:$0 sm:$0xff]  ;;  %s1610_s22 = smov 64   ;;  %v1611_v16 = vmov 1983009808   ;;  %s1834_s23 = sshll.u32 %s1591_s27, 5 }
  0x32   : > { %v479_v34 = vand.u32 4294901760, %v478_v31  ;;  %s1842_s13 = sshll.u32 %s1749_s12, 5  ;;  %s1012_s20 = scalar_lea.hbm %s2058_s5, %s1834_s23 }
  0x33   : > { %v461_v20 = vand.u32 4294901760, %v460_v17  ;;  %502 = vmatpush.msra.mxu2 %v460_v17  ;;  %533 = vmatpush.msra.mxu3 %v432_v18  ;;  %v467_v25 = vand.u32 4294901760, %v466_v21  ;;  %v473_v30 = vand.u32 4294901760, %v472_v26  ;;  %s1860_s1 = scalar_lea.vmem [#allocation8], %s1842_s13  ;;  %s1863_s8 = sshll.u32 %s1012_s20, 4  ;;  %s1016_s8 = int_to_ptr.hbm [resolvable:$true] %s1863_s8 }
  0x34   : > { %v1360_v3 = vpop.eup %1359  ;;  %433 = vmatpush.msra.mxu0 %v432_v18  ;;  %v480_v36 = vsub.f32 %v478_v31, %v479_v34  ;;  %s1013_s3 = sshll.u32 %s1860_s1, 4  ;;  %s1473_s20 = scalar_lea.hbm %s2058_s5, 64  ;;  %s1879_s3 = int_to_ptr.vmem [resolvable:$true] %s1013_s3 }
  0x35   : > { %v374_v4 = vmul.f32 32.0, %v1360_v3  ;;  %vm378_vm1 = vweird.f32 %v1360_v3  ;;  %v462_v24 = vsub.f32 %v460_v17, %v461_v20  ;;  %505 = vmatpush.msra.mxu2 %v466_v21  ;;  %535 = vmatpush.msra.mxu3 %v434_v22  ;;  %v468_v29 = vsub.f32 %v466_v21, %v467_v25 }
  0x36   : > { %435 = vmatpush.msra.mxu0 %v434_v22  ;;  %v474_v33 = vsub.f32 %v472_v26, %v473_v30  ;;  %v481_v37 = vand.u32 4294901760, %v480_v36  ;;  %v620_v17 = vunpack.c.l.s4 %v1611_v16 }
  0x37   : > { %v375_v5 = vsub.f32 1.0, %v374_v4  ;;  %v463_v28 = vand.u32 4294901760, %v462_v24  ;;  %508 = vmatpush.msra.mxu2 %v472_v26  ;;  %537 = vmatpush.msra.mxu3 %v436_v27  ;;  %v469_v32 = vand.u32 4294901760, %v468_v29 }
  0x38   : > { %437 = vmatpush.msra.mxu0 %v436_v27  ;;  %v475_v35 = vand.u32 4294901760, %v474_v33  ;;  %v1775_v21 = vunpack.c.0.s8 %v620_v17 }
  0x39   : > { %v376_v6 = vmul.f32 %v1360_v3, %v375_v5  ;;  %464 = vmatpush.msra.mxu1 %v463_v28  ;;  %511 = vmatpush.msra.mxu2 %v478_v31 }
  0x3a   : > { %560 = vmatpush.msrb.mxu0 %v461_v20 }
  0x3b   : > { %v377_v7 = vadd.f32 %v1360_v3, %v376_v6  ;;  %470 = vmatpush.msra.mxu1 %v469_v32 }
  0x3c   : > { %564 = vmatpush.msrb.mxu0 %v467_v25 }
  0x3d   : > { %v379_v8 = vsel %vm378_vm1, %v1360_v3, %v377_v7  ;;  %476 = vmatpush.msra.mxu1 %v475_v35 }
  0x3e   : > { %568 = vmatpush.msrb.mxu0 %v473_v30 }
  0x3f   : > { %482 = vmatpush.msra.mxu1 %v481_v37 }
  0x40   : > { %572 = vmatpush.msrb.mxu0 %v479_v34  ;;  %v1612_v34 = vmov 1934713408  }
  0x41   : > { %591 = vmatpush.msrb.mxu1 %v430_v15  ;;  %v644_v35 = vunpack.c.l.s4 %v1612_v34 }
  0x43   : > { %593 = vmatpush.msrb.mxu1 %v432_v18 }
  0x45   : > { %595 = vmatpush.msrb.mxu1 %v434_v22 }
  0x47   : > { %597 = vmatpush.msrb.mxu1 %v436_v27 }
  0xa2   : > { %v372_v9 = vpop.xlane.xlu0 %371 }
  0xa3   : > { %v380_v10 = vmul.f32 %v379_v8, %v372_v9 }
  0xa5   : > { %v1762_v11 = vsub.f32 %v366_v0, %v380_v10 }
  0xa7   : > { %v382_v12 = vmul.f32 %v1762_v11, %v1762_v11 }
  0xa9   : > { %v383_v13 = vsel %vm369_vm0, %v382_v12, 0.0 }
  0xaa   : > { %384 = vadd.xlane.f32.xlu0 %v383_v13 }
 0x11d   : > { %v385_v38 = vpop.xlane.xlu0 %384 }
 0x11e   : > { %v386_v39 = vmul.f32 %v385_v38, %v379_v8 }
 0x120   : > { %v387_v40 = vadd.f32 1e-05, %v386_v39 }
 0x122   : > { %1361 = vrsqrt.f32 %v387_v40  ;;  %vm394_vm3 = vweird.f32 %v387_v40 }
 0x128   : > { %v1362_v41 = vpop.eup %1361 }
 0x129   : > { %v389_v42 = vmul.f32 %v1362_v41, %v387_v40  ;;  %vm395_vm2 = vweird.f32 %v1362_v41 }
 0x12a   : > { %vm396_vm4 = vmor %vm394_vm3, %vm395_vm2 }
 0x12b   : > { %v390_v43 = vmul.f32 %v1362_v41, %v389_v42 }
 0x12d   : > { %v391_v44 = vmul.f32 0.5, %v390_v43 }
 0x12f   : > { %v392_v45 = vsub.f32 1.5, %v391_v44 }
 0x131   : > { %v393_v46 = vmul.f32 %v1362_v41, %v392_v45  ;;  %v1789_v45 = vunpack.c.0.s8 %v644_v35 }
 0x133   : > { %v397_v48 = vsel %vm396_vm4, %v1362_v41, %v393_v46 }
 0x134   : > { %v398_v49 = vmul.f32 %v397_v48, %v1762_v11 }
 0x136   : > { %v402_v51 = vmul.f32 %v1356_v47, %v398_v49 }
 0x138   : > { %v406_v52 = vadd.f32 %v1357_v50, %v402_v51 }
 0x13a   : > { %v416_v53 = vsel %vm369_vm0, %v406_v52, 0 }
 0x13b   : > { %v438_v54 = vand.u32 4294901760, %v416_v53 }
 0x13d   : > { %484 = vmatmul.f32.vlgmr.msra.gmra.mxu1 %v438_v54  ;;  %v439_v55 = vsub.f32 %v416_v53, %v438_v54 }
 0x13f   : > { %514 = vmatmul.f32.vlgmr.msra.gmra.mxu2 %v439_v55  ;;  %v440_v56 = vand.u32 4294901760, %v439_v55 }
 0x141   : > { %541 = vmatmul.f32.vlgmr.msra.gmra.mxu3 %v440_v56  ;;  %v441_v57 = vsub.f32 %v439_v55, %v440_v56 }
 0x143   : > { %v442_v58 = vand.u32 4294901760, %v441_v57 }
 0x145   : > { %443 = vmatmul.f32.vlgmr.msra.gmra.mxu0 %v442_v58  ;;  %599 = vmatmul.f32.vlgmr.msrb.gmra.mxu1 %v438_v54 }
 0x14d   : > { %574 = vmatmul.f32.vlgmr.msrb.gmra.mxu0 %v438_v54 }
 0x1ba   : > { %v485_v60 = vpop.f32.mrf.mxu1 }
 0x1c2   : > { %v444_v61 = vpop.f32.mrf.mxu0  ;;  %v515_v0 = vpop.f32.mrf.mxu2 }
 0x1c3   : > { %v445_v62 = vadd.f32 %v1358_v59, %v444_v61  ;;  %v600_v6 = vpop.f32.mrf.mxu1 }
 0x1c4   : > { %v542_v2 = vpop.f32.mrf.mxu3 }
 0x1c5   : > { %v486_v63 = vadd.f32 %v485_v60, %v445_v62 }
 0x1c7   : > { %v516_v1 = vadd.f32 %v515_v0, %v486_v63 }
 0x1c9   : > { %v543_v3 = vadd.f32 %v542_v2, %v516_v1 }
 0x1ca   : > { %v575_v4 = vpop.f32.mrf.mxu0 }
 0x1cb   : > { %v576_v5 = vadd.f32 %v575_v4, %v543_v3 }
 0x1cd   : > { %v601_v7 = vadd.f32 %v600_v6, %v576_v5 }
 0x1cf   : > { %735 = vrot.lane.b32.xlu2 %v601_v7, %s1606_s14  ;;  %733 = vrot.lane.b32.xlu1 %v601_v7, %s1607_s16  ;;  %v603_v8 = vmul.f32 0.35355338, %v601_v7 }
 0x1d1   : > { %v617_v20 = vrot.slane %v603_v8, 4 }
 0x1d7   : > { %737 = vrot.lane.b32.xlu2 %v601_v7, %s1608_s17  ;;  %731 = vrot.lane.b32.xlu1 %v601_v7, %s1609_s21 }
 0x1df   : > { %863 = vrot.lane.b32.xlu2 %v601_v7, %s1610_s22  ;;  %608 = vrot.lane.b32.xlu1 %v603_v8, %s1607_s16  ;;  %s1030_s16 = scalar_lea.hbm %s2059_s6, %s1834_s23 }
 0x1e7   : > { %605 = vrot.lane.b32.xlu2 %v603_v8, %s1609_s21  ;;  %s1467_s21 = sshra.s32 %s1016_s8, 4  ;;  %s1468_s21 = int_to_ptr.hbm [resolvable:$true] %s1467_s21 }
 0x1e8   : > { %p1474_p11 = scmp.lt.s32.totalorder %s1468_s21, %s2058_s5 }
 0x229   : > { %v736_v11 = vpop.permute.xlu2 %735 }
 0x231   : > { %v738_v12 = vpop.permute.xlu2 %737 }
 0x232   : > { %v751_v25 = vrot.slane %v738_v12, 4 }
 0x239   : > { %v864_v13 = vpop.permute.xlu2 %863 }
 0x23a   : > { %v877_v28 = vrot.slane %v864_v13, 4 }
 0x241   : > { %v734_v9 = vpop.permute.xlu1 %733  ;;  %v606_v14 = vpop.permute.xlu2 %605 }
 0x242   : > { %741 = vrot.lane.b32.xlu0 %v734_v9, %s1608_s17  ;;  %867 = vrot.lane.b32.xlu1 %v734_v9, %s1610_s22  ;;  %v629_v39 = vrot.slane %v606_v14, 4 }
 0x249   : > { %v732_v10 = vpop.permute.xlu1 %731 }
 0x24a   : > { %611 = vrot.lane.b32.xlu0 %v603_v8, %s1606_s14  ;;  %739 = vrot.lane.b32.xlu2 %v732_v10, %s1608_s17 }
 0x24b   : > { %743 = vrot.lane.b32.xlu1 %v736_v11, %s1608_s17  ;;  %s990_s17 = scalar_lea.sflag [#allocation4], %s1749_s12 }
 0x251   : > { %v609_v15 = vpop.permute.xlu1 %608 }
 0x252   : > { %869 = vrot.lane.b32.xlu2 %v736_v11, %s1610_s22  ;;  %v614_v19 = vrot.slane %v609_v15, 4  ;;  %v618_v22 = vsel %vm615_vm5, %v609_v15, %v617_v20 }
 0x253   : > { %865 = vrot.lane.b32.xlu1 %v732_v10, %s1610_s22  ;;  %v626_v29 = vperm.slane %v618_v22, %v1775_v21  ;;  %s1469_s22 = scalar_lea.hbm %s1468_s21, 32 }
 0x254   : > { %v616_v26 = vsel %vm615_vm5, %v614_v19, %v603_v8  ;;  %p1470_p1 = scmp.ne.s32.totalorder %s1468_s21, %s1469_s22  ;;  %p1475_p12 = scmp.lt.s32.totalorder %s1473_s20, %s1469_s22 }
 0x255   : > { %v622_v31 = vperm.slane %v616_v26, %v1775_v21  ;;  %v653_v40 = vrot.slane %v626_v29, 4 }
 0x256   : > { %p1471_p3 = pnand %p1470_p1, %p1729_p2  ;;  %p1476_p13 = por %p1475_p12, %p1474_p11 }
 0x257   : > { %v641_v42 = vrot.slane %v622_v31, 4 }
 0x258   : > { %p1472_p7 = pneg %p1471_p3 }
 0x25a   : > { %p1477_p0 = pnand %p1476_p13, %p1472_p7 }
 0x2a4   : > { %v740_v18 = vpop.permute.xlu2 %739 }
 0x2a5   : > { %v763_v43 = vrot.slane %v740_v18, 4 }
 0x2ac   : > { %v1783_v36 = vpop.permute.xlu2 %869 }
 0x2ad   : > { %v887_v47 = vrot.slane %v1783_v36, 4 }
 0x2b4   : > { %v742_v23 = vpop.permute.xlu0 %741  ;;  %v868_v24 = vpop.permute.xlu1 %867 }
 0x2b5   : > { %v749_v27 = vrot.slane %v742_v23, 4  ;;  %v752_v30 = vsel %vm615_vm5, %v742_v23, %v751_v25  ;;  %v875_v33 = vrot.slane %v868_v24, 4  ;;  %v878_v38 = vsel %vm615_vm5, %v868_v24, %v877_v28 }
 0x2b6   : > { %v760_v37 = vperm.slane %v752_v30, %v1775_v21  ;;  %v1793_v48 = vperm.slane %v878_v38, %v1775_v21 }
 0x2b7   : > { %v750_v32 = vsel %vm615_vm5, %v749_v27, %v738_v12  ;;  %v876_v44 = vsel %vm615_vm5, %v875_v33, %v864_v13 }
 0x2b8   : > { %v756_v41 = vperm.slane %v750_v32, %v1775_v21  ;;  %v787_v52 = vrot.slane %v760_v37, 4  ;;  %v1799_v57 = vperm.slane %v876_v44, %v1775_v21 }
 0x2ba   : > { %v775_v56 = vrot.slane %v756_v41, 4 }
 0x2bc   : > { %v612_v46 = vpop.permute.xlu0 %611 }
 0x2bd   : > { %v627_v49 = vrot.slane %v612_v46, 4  ;;  %v630_v50 = vsel %vm615_vm5, %v612_v46, %v629_v39  ;;  %v744_v51 = vpop.permute.xlu1 %743 }
 0x2be   : > { %v638_v53 = vperm.slane %v630_v50, %v1775_v21  ;;  %v761_v54 = vrot.slane %v744_v51, 4  ;;  %v764_v55 = vsel %vm615_vm5, %v744_v51, %v763_v43 }
 0x2bf   : > { %v628_v58 = vsel %vm615_vm5, %v627_v49, %v606_v14  ;;  %v772_v59 = vperm.slane %v764_v55, %v1775_v21 }
 0x2c0   : > { %v634_v60 = vperm.slane %v628_v58, %v1775_v21  ;;  %v651_v61 = vrot.slane %v638_v53, 4  ;;  %v654_v62 = vsel %vm615_vm5, %v638_v53, %v653_v40  ;;  %v762_v63 = vsel %vm615_vm5, %v761_v54, %v740_v18 }
 0x2c1   : > { %v662_v0 = vperm.slane %v654_v62, %v1789_v45  ;;  %v768_v1 = vperm.slane %v762_v63, %v1775_v21  ;;  %v785_v2 = vrot.slane %v772_v59, 4  ;;  %v788_v3 = vsel %vm615_vm5, %v772_v59, %v787_v52 }
 0x2c2   : > { %v639_v4 = vrot.slane %v634_v60, 4  ;;  %v642_v5 = vsel %vm615_vm5, %v634_v60, %v641_v42  ;;  %v652_v6 = vsel %vm615_vm5, %v651_v61, %v626_v29  ;;  %v796_v7 = vperm.slane %v788_v3, %v1789_v45 }
 0x2c3   : > { %v650_v8 = vperm.slane %v642_v5, %v1789_v45  ;;  %v658_v9 = vperm.slane %v652_v6, %v1789_v45  ;;  %v669_v10 = vrot.slane %v662_v0, 4  ;;  %v773_v11 = vrot.slane %v768_v1, 4 }
 0x2c4   : > { %v640_v12 = vsel %vm615_vm5, %v639_v4, %v622_v31  ;;  %v776_v13 = vsel %vm615_vm5, %v768_v1, %v775_v56  ;;  %v786_v14 = vsel %vm615_vm5, %v785_v2, %v760_v37  ;;  %v803_v15 = vrot.slane %v796_v7, 4 }
 0x2c5   : > { %v646_v16 = vperm.slane %v640_v12, %v1789_v45  ;;  %v665_v17 = vrot.slane %v650_v8, 4  ;;  %v667_v18 = vrot.slane %v658_v9, 4  ;;  %v670_v19 = vsel %vm615_vm5, 0.0, %v669_v10  ;;  %v866_v6 = vpop.permute.xlu1 %865 }
 0x2c6   : > { %v682_v20 = vsel %vm615_vm5, %v669_v10, %v658_v9  ;;  %v687_v22 = vrot.slane %v670_v19, 4  ;;  %v774_v23 = vsel %vm615_vm5, %v773_v11, %v756_v41  ;;  %v784_v24 = vperm.slane %v776_v13, %v1789_v45 }
 0x2c7   : > { %v663_v25 = vrot.slane %v646_v16, 4  ;;  %v666_v26 = vsel %vm615_vm5, 0.0, %v665_v17  ;;  %v668_v27 = vsel %vm615_vm5, 0.0, %v667_v18  ;;  %v671_v28 = vsel %vm615_vm5, %v665_v17, %v646_v16 }
 0x2c8   : > { %v675_v29 = vperm.slane %v671_v28, %v1775_v21  ;;  %v676_v30 = vrot.slane %v666_v26, 4  ;;  %v686_v31 = vperm.slane %v682_v20, %v1775_v21  ;;  %v688_v32 = vsel %vm615_vm5, %v687_v22, %v668_v27 }
 0x2c9   : > { %v664_v33 = vsel %vm615_vm5, 0.0, %v663_v25  ;;  %v692_v34 = vperm.slane %v688_v32, %v1775_v21  ;;  %v780_v35 = vperm.slane %v774_v23, %v1789_v45  ;;  %v792_v37 = vperm.slane %v786_v14, %v1789_v45 }
 0x2ca   : > { %v677_v38 = vsel %vm615_vm5, %v676_v30, %v664_v33  ;;  %v695_v39 = vrot.slane %v675_v29, 4  ;;  %v707_v40 = vrot.slane %v686_v31, 4  ;;  %v799_v41 = vrot.slane %v784_v24, 4 }
 0x2cb   : > { %v681_v42 = vperm.slane %v677_v38, %v1775_v21  ;;  %v705_v43 = vrot.slane %v692_v34, 4  ;;  %v797_v44 = vrot.slane %v780_v35, 4  ;;  %v801_v46 = vrot.slane %v792_v37, 4 }
 0x2cc   : > { %v708_v49 = vsel %vm615_vm5, %v692_v34, %v707_v40  ;;  %v800_v50 = vsel %vm615_vm5, 0.0, %v799_v41  ;;  %v804_v51 = vsel %vm615_vm5, 0.0, %v803_v15  ;;  %v805_v52 = vsel %vm615_vm5, %v799_v41, %v780_v35 }
 0x2cd   : > { %v693_v53 = vrot.slane %v681_v42, 4  ;;  %v696_v54 = vsel %vm615_vm5, %v681_v42, %v695_v39  ;;  %v706_v55 = vsel %vm615_vm5, %v705_v43, %v686_v31  ;;  %v716_v56 = vperm.slane %v708_v49, %v1789_v45 }
 0x2ce   : > { %v704_v58 = vperm.slane %v696_v54, %v1789_v45  ;;  %v712_v59 = vperm.slane %v706_v55, %v1789_v45  ;;  %v798_v60 = vsel %vm615_vm5, 0.0, %v797_v44  ;;  %v802_v61 = vsel %vm615_vm5, 0.0, %v801_v46 }
 0x2cf   : > { %v694_v62 = vsel %vm615_vm5, %v693_v53, %v675_v29  ;;  %v721_v63 = vrot.slane %v716_v56, 4  ;;  %v809_v0 = vperm.slane %v805_v52, %v1775_v21  ;;  %v810_v1 = vrot.slane %v800_v50, 4 }
 0x2d0   : > { %v700_v2 = vperm.slane %v694_v62, %v1789_v45  ;;  %v717_v3 = vrot.slane %v712_v59, 4  ;;  %v723_v4 = vrot.slane %v704_v58, 4  ;;  %v816_v5 = vsel %vm615_vm5, %v803_v15, %v792_v37 }
 0x2d1   : > { %v722_v7 = vsel %vm615_vm5, %v721_v63, %v704_v58  ;;  %v811_v8 = vsel %vm615_vm5, %v810_v1, %v798_v60  ;;  %v820_v9 = vperm.slane %v816_v5, %v1775_v21  ;;  %v821_v10 = vrot.slane %v804_v51, 4 }
 0x2d2   : > { %v718_v11 = vsel %vm615_vm5, %v717_v3, %v700_v2  ;;  %v719_v12 = vrot.slane %v700_v2, 4  ;;  %v724_v13 = vsel %vm615_vm5, %v716_v56, %v723_v4  ;;  %v815_v14 = vperm.slane %v811_v8, %v1775_v21  ;;  %728 = vst.msk [vmem:[%s1860_s1 + $0x10] sm:$0xff] %vm725_vm6, %v722_v7 }
 0x2d3   : > { %v822_v15 = vsel %vm615_vm5, %v821_v10, %v802_v61  ;;  %v829_v16 = vrot.slane %v809_v0, 4  ;;  %v841_v17 = vrot.slane %v820_v9, 4  ;;  %v888_v18 = vsel %vm615_vm5, %v887_v47, %v866_v6  ;;  %726 = vst.msk [vmem:[%s1860_s1] sm:$0xff] %vm725_vm6, %v718_v11 }
 0x2d4   : > { %v720_v19 = vsel %vm615_vm5, %v712_v59, %v719_v12  ;;  %v826_v20 = vperm.slane %v822_v15, %v1775_v21  ;;  %v827_v22 = vrot.slane %v815_v14, 4  ;;  %v889_v23 = vrot.slane %v866_v6, 4  ;;  %729 = vst.msk [vmem:[%s1860_s1 + $0x18] sm:$0xff] %vm725_vm6, %v724_v13 }
 0x2d5   : > { %v901_v24 = vrot.slane %v1799_v57, 4  ;;  %v913_v47 = vrot.slane %v1793_v48, 4  ;;  %v830_v25 = vsel %vm615_vm5, %v815_v14, %v829_v16  ;;  %v894_v26 = vperm.slane %v888_v18, %v1775_v21  ;;  %727 = vst.msk [vmem:[%s1860_s1 + $0x8] sm:$0xff] %vm725_vm6, %v720_v19 }
 0x2d6   : > { %v828_v27 = vsel %vm615_vm5, %v827_v22, %v809_v0  ;;  %v838_v28 = vperm.slane %v830_v25, %v1789_v45  ;;  %v839_v29 = vrot.slane %v826_v20, 4  ;;  %v842_v30 = vsel %vm615_vm5, %v826_v20, %v841_v17 }
 0x2d7   : > { %1480 = shalt.err (!%p1477_p0)
}
 0x2d8   : > { %s1613_s12 = smov 128   ;;  %s1614_s14 = smov 8   ;;  %v834_v31 = vperm.slane %v828_v27, %v1789_v45  ;;  %v850_v32 = vperm.slane %v842_v30, %v1789_v45  ;;  %v890_v33 = vsel %vm615_vm5, %v1783_v36, %v889_v23  ;;  %v899_v34 = vrot.slane %v894_v26, 4 }
 0x2d9   : > { %1261 = dma.vmem_to_hbm [thread:$0]  (%p1729_p2), %s1879_s3, 512, %s1016_s8, %s990_s17, %s1613_s12, %s1613_s12, %s1614_s14   ;;  %v840_v35 = vsel %vm615_vm5, %v839_v29, %v820_v9  ;;  %v857_v37 = vrot.slane %v838_v28, 4  ;;  %v898_v38 = vperm.slane %v890_v33, %v1775_v21  ;;  %v902_v39 = vsel %vm615_vm5, %v894_v26, %v901_v24 }
 0x2da   : > { %s994_s21 = sand.u32 1, %s1686_s30   ;;  %v846_v40 = vperm.slane %v840_v35, %v1789_v45  ;;  %v853_v41 = vrot.slane %v834_v31, 4  ;;  %v855_v42 = vrot.slane %v850_v32, 4  ;;  %v900_v43 = vsel %vm615_vm5, %v899_v34, %v1799_v57  ;;  %s358_s3 = scalar_lea.vmem [#allocation9], %s1842_s13 }
 0x2db   : > { %s1031_s8 = sshll.u32 %s358_s3, 4  ;;  %s1935_s27 = sshll.u32 %s1030_s16, 4  ;;  %v858_v36 = vsel %vm615_vm5, %v850_v32, %v857_v37  ;;  %v906_v44 = vperm.slane %v900_v43, %v1789_v45  ;;  %v910_v46 = vperm.slane %v902_v39, %v1789_v45  ;;  %v911_v49 = vrot.slane %v898_v38, 4  ;;  %s1948_s8 = int_to_ptr.vmem [resolvable:$true] %s1031_s8  ;;  %s1034_s27 = int_to_ptr.hbm [resolvable:$true] %s1935_s27 }
 0x2dc   : > { %v851_v50 = vrot.slane %v846_v40, 4  ;;  %v854_v51 = vsel %vm615_vm5, %v846_v40, %v853_v41  ;;  %v856_v57 = vsel %vm615_vm5, %v855_v42, %v838_v28  ;;  %v914_v52 = vsel %vm615_vm5, %v898_v38, %v913_v47  ;;  %862 = vst.msk [vmem:[%s358_s3 + $0x18] sm:$0xff] %vm725_vm6, %v858_v36  ;;  %s1961_s16 = scalar_lea.sflag [#allocation10], %s994_s21  ;;  %s1495_s18 = sshra.s32 %s1034_s27, 4  ;;  %s1496_s18 = int_to_ptr.hbm [resolvable:$true] %s1495_s18 }
 0x2dd   : > { %v912_v53 = vsel %vm615_vm5, %v911_v49, %v1793_v48  ;;  %v922_v54 = vperm.slane %v914_v52, %v1789_v45  ;;  %v923_v55 = vrot.slane %v906_v44, 4  ;;  %v925_v56 = vrot.slane %v910_v46, 4  ;;  %860 = vst.msk [vmem:[%s358_s3 + $0x8] sm:$0xff] %vm725_vm6, %v854_v51  ;;  %s1497_s20 = scalar_lea.hbm %s1496_s18, 32  ;;  %s1501_s17 = scalar_lea.hbm %s2059_s6, 64 }
 0x2de   : > { %v852_v58 = vsel %vm615_vm5, %v851_v50, %v834_v31  ;;  %v918_v59 = vperm.slane %v912_v53, %v1789_v45  ;;  %861 = vst.msk [vmem:[%s358_s3 + $0x10] sm:$0xff] %vm725_vm6, %v856_v57  ;;  %p1498_p4 = scmp.ne.s32.totalorder %s1496_s18, %s1497_s20  ;;  %p1502_p10 = scmp.lt.s32.totalorder %s1496_s18, %s2059_s6 }
 0x2df   : > { %v924_v48 = vsel %vm615_vm5, 0.0, %v923_v55  ;;  %v926_v60 = vsel %vm615_vm5, 0.0, %v925_v56  ;;  %v929_v61 = vrot.slane %v922_v54, 4  ;;  %v931_v62 = vsel %vm615_vm5, %v925_v56, %v906_v44  ;;  %859 = vst.msk [vmem:[%s358_s3] sm:$0xff] %vm725_vm6, %v852_v58  ;;  %p1503_p1 = scmp.lt.s32.totalorder %s1501_s17, %s1497_s20 }
 0x2e0   : > { %v927_v63 = vrot.slane %v918_v59, 4  ;;  %v935_v0 = vperm.slane %v931_v62, %v1775_v21  ;;  %v936_v1 = vrot.slane %v926_v60, 4  ;;  %p1499_p6 = pnand %p1498_p4, %p1729_p2 }
 0x2e1   : > { %p1504_p3 = por %p1503_p1, %p1502_p10 }
 0x2e2   : > { %p1500_p9 = pneg %p1499_p6 }
 0x2e4   : > { %p1505_p7 = pnand %p1504_p3, %p1500_p9 }
 0x2e6   : > { %1508 = shalt.err (!%p1505_p7)
}
 0x2e7   : > { %1262 = dma.vmem_to_hbm [thread:$0]  (%p1729_p2), %s1948_s8, 512, %s1034_s27, %s1961_s16, %s1613_s12, %s1613_s12, %s1614_s14   ;;  %v930_v2 = vsel %vm615_vm5, 0.0, %v929_v61  ;;  %v942_v3 = vsel %vm615_vm5, %v929_v61, %v918_v59  ;;  %v928_v4 = vsel %vm615_vm5, 0.0, %v927_v63  ;;  %v937_v5 = vsel %vm615_vm5, %v936_v1, %v924_v48 }
 0x2e8   : > { %v946_v6 = vperm.slane %v942_v3, %v1775_v21  ;;  %v947_v7 = vrot.slane %v930_v2, 4  ;;  %v941_v8 = vperm.slane %v937_v5, %v1775_v21  ;;  %v955_v9 = vrot.slane %v935_v0, 4  ;;  %s1048_s8 = scalar_lea.hbm %s2060_s7, %s1834_s23  ;;  %s365_s18 = scalar_lea.vmem [#allocation11], %s1842_s13 }
 0x2e9   : > { %s2003_s27 = sshll.u32 %s1048_s8, 4  ;;  %s1049_s20 = sshll.u32 %s365_s18, 4  ;;  %s1050_s20 = int_to_ptr.vmem [resolvable:$true] %s1049_s20  ;;  %s1052_s27 = int_to_ptr.hbm [resolvable:$true] %s2003_s27 }
 0x2ea   : > { %v948_v10 = vsel %vm615_vm5, %v947_v7, %v928_v4  ;;  %v967_v11 = vrot.slane %v946_v6, 4  ;;  %v953_v13 = vrot.slane %v941_v8, 4  ;;  %v956_v14 = vsel %vm615_vm5, %v941_v8, %v955_v9  ;;  %s1523_s23 = sshra.s32 %s1052_s27, 4  ;;  %s1529_s17 = scalar_lea.hbm %s2060_s7, 64  ;;  %s1524_s23 = int_to_ptr.hbm [resolvable:$true] %s1523_s23 }
 0x2eb   : > { %v952_v12 = vperm.slane %v948_v10, %v1775_v21  ;;  %v964_v15 = vperm.slane %v956_v14, %v1789_v45  ;;  %s1525_s13 = scalar_lea.hbm %s1524_s23, 32  ;;  %p1530_p0 = scmp.lt.s32.totalorder %s1524_s23, %s2060_s7 }
 0x2ec   : > { %v954_v16 = vsel %vm615_vm5, %v953_v13, %v935_v0  ;;  %p1526_p11 = scmp.ne.s32.totalorder %s1524_s23, %s1525_s13  ;;  %p1531_p4 = scmp.lt.s32.totalorder %s1529_s17, %s1525_s13 }
 0x2ed   : > { %v965_v17 = vrot.slane %v952_v12, 4  ;;  %v968_v18 = vsel %vm615_vm5, %v952_v12, %v967_v11  ;;  %v960_v19 = vperm.slane %v954_v16, %v1789_v45  ;;  %v983_v21 = vrot.slane %v964_v15, 4 }
 0x2ee   : > { %v976_v20 = vperm.slane %v968_v18, %v1789_v45  ;;  %p1527_p12 = pnand %p1526_p11, %p1729_p2  ;;  %p1532_p6 = por %p1531_p4, %p1530_p0 }
 0x2ef   : > { %v966_v22 = vsel %vm615_vm5, %v965_v17, %v946_v6  ;;  %v979_v24 = vrot.slane %v960_v19, 4 }
 0x2f0   : > { %v972_v23 = vperm.slane %v966_v22, %v1789_v45  ;;  %v981_v47 = vrot.slane %v976_v20, 4  ;;  %v984_v25 = vsel %vm615_vm5, %v976_v20, %v983_v21  ;;  %p1528_p13 = pneg %p1527_p12 }
 0x2f1   : > { %988 = vst.msk [vmem:[%s365_s18 + $0x18] sm:$0xff] %vm725_vm6, %v984_v25 }
 0x2f2   : > { %v977_v26 = vrot.slane %v972_v23, 4  ;;  %v980_v27 = vsel %vm615_vm5, %v972_v23, %v979_v24  ;;  %v982_v28 = vsel %vm615_vm5, %v981_v47, %v964_v15  ;;  %p1533_p9 = pnand %p1532_p6, %p1528_p13 }
 0x2f3   : > { %986 = vst.msk [vmem:[%s365_s18 + $0x8] sm:$0xff] %vm725_vm6, %v980_v27 }
 0x2f4   : > { %v978_v45 = vsel %vm615_vm5, %v977_v26, %v960_v19  ;;  %987 = vst.msk [vmem:[%s365_s18 + $0x10] sm:$0xff] %vm725_vm6, %v982_v28 }
 0x2f5   : > { %985 = vst.msk [vmem:[%s365_s18] sm:$0xff] %vm725_vm6, %v978_v45 }
 0x2f6   : > { %1536 = shalt.err (!%p1533_p9)
}
 0x2f7   : > { %1263 = dma.vmem_to_hbm [thread:$0]  (%p1729_p2), %s1050_s20, 512, %s1052_s27, %s1961_s16, %s1613_s12, %s1613_s12, %s1614_s14  }
 0x2f8 PF: > { %s1066_s30 = sand.u32 1, %s1579_s24   ;;  %p1279_p10 = pnand %p1227_p8, %p1701_p5 }
 0x2f9   : > { %s1067_s21 = scalar_lea.sflag [#allocation4], %s1066_s30 }
 0x2fa   : > { %p1280_p1 = pneg %p1279_p10 }
 0x2fc   : > { %1570 = dma.done.wait (%p1280_p1), %s1067_s21, 512  }
 0x2fd   : > { %1572 = vsyncadd (%p1280_p1), %s1067_s21, 4294966784  ;;  %s2070_s8 = sadd.s32 4294967294, %s1599_s29  }
 0x2fe   : > { %s1076_s15 = sand.u32 1, %s2070_s8  }
 0x2ff   : > { %s1077_s18 = scalar_lea.sflag [#allocation10], %s1076_s15 }
 0x300   : > { %1574 = dma.done.wait (%p1280_p1), %s1077_s18, 1024  }
 0x301   : > { %1576 = vsyncadd (%p1280_p1), %s1077_s18, 4294966272  ;;  %s28_s29 = sadd.s32 1, %s1599_s29   ;;  %s2071_s24 = smov %s1583_s25 }
 0x302   : > { %p25_p2 = scmp.ge.s32.totalorder %s28_s29, 4   ;;  %s2072_s25 = smov %s1587_s26 }
 0x303   : > { %s2073_s26 = smov %s1739_s19  ;;  %s2074_s27 = smov %s1595_s28 }
 0x304   : > { %s2075_s28 = smov %s2077_s11  ;;  %27 = sbr.rel (!%p25_p2) target bundleno = 12 (0xc), region = 125 }
 0x309   :  { %1093 = vsyncpa [#allocation3], 1 }
 0x30a   :  { %1095 = vsyncpa [#allocation3 + $0x1], 1 }
 0x30b   :  { %1096 = vsyncpa [#allocation6], 1 }
 0x30c   :  { %1097 = vsyncpa [#allocation4], 1 }
 0x30d   :  { %1099 = vsyncpa [#allocation4 + $0x1], 1 }
 0x30e   :  { %1100 = vsyncpa [#allocation10], 1 }
 0x30f   :  { %1102 = vsyncpa [#allocation10 + $0x1], 1 }

// kernel: tpu_custom_call.1
= control target key start
LH: loop header
LB: loop body
LE: loop exit
PB: predicated region body
PF: predicated region fallthrough
CT: control target
= control target key end

     0   :  { %s2053_s0 = inlined_call_operand.hbm [shape: f32[2,8,32], index: 0, kind: input, shape index: {}]   ;;  %s2054_s1 = inlined_call_operand.hbm [shape: f32[1,32], index: 1, kind: input, shape index: {}]   ;;  %s2055_s2 = inlined_call_operand.vmem [shape: f32[1,32], index: 2, kind: input, shape index: {}]   ;;  %s2056_s3 = inlined_call_operand.hbm [shape: f32[32,96], index: 3, kind: input, shape index: {}]   ;;  %s2057_s4 = inlined_call_operand.vmem [shape: f32[1,96], index: 4, kind: input, shape index: {}]   ;;  %s2058_s5 = inlined_call_operand.hbm [shape: f32[2,4,8,8], index: 5, kind: output, shape index: {0}]   ;;  %s2059_s6 = inlined_call_operand.hbm [shape: f32[2,4,8,8], index: 6, kind: output, shape index: {1}]   ;;  %s2060_s7 = inlined_call_operand.hbm [shape: f32[2,4,8,8], index: 7, kind: output, shape index: {2}]  }
   0x1   :  { %2062 = sst [smem:[#allocation16_spill]] %s2054_s1 }
   0x2   :  { %2063 = sst [smem:[#allocation17_spill]] %s2056_s3 }
   0x3   :  { %13 = vsyncpa [#allocation3], 0 }
   0x4   :  { %15 = vsyncpa [#allocation3 + $0x1], 0 }
   0x5   :  { %16 = vsyncpa [#allocation6], 0 }
   0x6   :  { %17 = vsyncpa [#allocation4], 0 }
   0x7   :  { %19 = vsyncpa [#allocation4 + $0x1], 0 }
   0x8   :  { %20 = vsyncpa [#allocation10], 0 }
   0x9   :  { %22 = vsyncpa [#allocation10 + $0x1], 0  ;;  %s1655_s24 = smov 0   ;;  %s1657_s25 = smov 0  }
   0xa   :  { %s1659_s26 = smov 0   ;;  %s1661_s27 = smov 0  }
   0xb   :  { %s1663_s28 = smov 0   ;;  %s1665_s29 = smov 0  }
   0xc LB: > { %s1686_s30 = sadd.s32 4294967295, %s1599_s29   ;;  %s2061_s8 = sadd.s32 4294967294, %s1599_s29   ;;  %s1599_s29 = sphi %s1665_s29, %s28_s29   ;;  %s1595_s28 = sphi %s1663_s28, %s2075_s28   ;;  %s1591_s27 = sphi %s1661_s27, %s2074_s27   ;;  %s1587_s26 = sphi %s1659_s26, %s2073_s26   ;;  %s1583_s25 = sphi %s1657_s25, %s2072_s25   ;;  %s1579_s24 = sphi %s1655_s24, %s2071_s24  }
   0xd   : > { %p62_p0 = scmp.ne.s32.totalorder %s1583_s25, %s1579_s24  ;;  %p63_p1 = scmp.eq.s32.totalorder %s1686_s30, 0 }
   0xe   : > { %p178_p2 = scmp.eq.s32.totalorder %s2061_s8, 1  ;;  %p1224_p4 = scmp.ge.s32.totalorder %s1599_s29, 1 }
   0xf   : > { %p1696_p3 = por %p63_p1, %p62_p0  ;;  %p241_p6 = scmp.lt.s32.totalorder %s1599_s29, 3 }
  0x10   : > { %p1701_p5 = por %p178_p2, %p62_p0  ;;  %s2066_s1 = sld [smem:[#allocation16_spill]] }
  0x11   : > { %p1709_p7 = pnand %p1224_p4, %p241_p6  ;;  %p1227_p8 = scmp.ge.s32.totalorder %s1599_s29, 2 }
  0x12   : > { %s1601_s15 = smov [#allocation5]   ;;  %s2068_s3 = sld [smem:[#allocation17_spill]] }
  0x13   : > { %p1267_p9 = pneg %p1709_p7  ;;  %s255_s16 = sshll.u32 %s1601_s15, 4  ;;  %s256_s16 = int_to_ptr.vmem [resolvable:$true] %s255_s16 }
  0x14   : > { %s1602_s20 = smov [#allocation7]   ;;  %s1603_s22 = smov 128  }
  0x15   : > { %p1268_p10 = pnand %p1267_p9, %p63_p1  ;;  %s269_s21 = sshll.u32 %s1602_s20, 4  ;;  %s270_s21 = int_to_ptr.vmem [resolvable:$true] %s269_s21 }
  0x16   : > { %s253_s13 = sshll.u32 %s2066_s1, 4  ;;  %s1604_s23 = smov 8   ;;  %s254_s13 = int_to_ptr.hbm [resolvable:$true] %s253_s13 }
  0x17   : > { %1270 = dma.hbm_to_vmem [thread:$0]  (!%p1268_p10), %s254_s13, 16, %s256_s16, [#allocation6]  }
  0x18   : > { %s267_s19 = sshll.u32 %s2068_s3, 4  ;;  %p172_p11 = scmp.eq.s32.totalorder %s1686_s30, 1  ;;  %s268_s19 = int_to_ptr.hbm [resolvable:$true] %s267_s19 }
  0x19   : > { %1273 = dma.hbm_to_vmem [thread:$0]  (!%p1268_p10), %s268_s19, 512, %s270_s21, [#allocation6], %s1603_s22, %s1603_s22, %s1604_s23  }
  0x1a   : > { %s40_s11 = sadd.s32 1, %s1595_s28  ;;  %s49_s12 = sadd.s32 1, %s1587_s26 }
  0x1b   : > { %p42_p12 = scmp.ge.s32.totalorder %s40_s11, 2  ;;  %p56_p13 = scmp.ne.s32.totalorder %s1587_s26, %s1583_s25 }
  0x1c   : > { %p57_p0 = scmp.eq.s32.totalorder %s1599_s29, 0  ;;  %p1290_p4 = scmp.lt.s32.totalorder %s1599_s29, 2 }
  0x1d   : > { %s2077_s11 = smov (%p42_p12, %s40_s11), 0  ;;  %p1729_p2 = por %p172_p11, %p56_p13 }
  0x1e   : > { %s44_s13 = ssub.s32 %s1595_s28, %s2077_s11  ;;  %s286_s16 = sand.u32 1, %s1587_s26  }
  0x1f   : > { %p47_p6 = scmp.eq.s32.totalorder %s44_s13, 0  ;;  %p58_p9 = por %p57_p0, %p56_p13 }
  0x20   : > { %s1228_s17 = sshll.u32 %s286_s16, 3  ;;  %s1229_s18 = sshll.u32 %s1595_s28, 3 }
  0x21   : > { %s1739_s19 = scalar_select %p47_p6, %s1587_s26, %s49_s12  }
  0x22   : > { %s295_s22 = scalar_lea.hbm %s2053_s0, %s1229_s18  ;;  %s290_s8 = scalar_lea.vmem [#allocation2], %s1228_s17 }
  0x23   : > { %s297_s23 = sshll.u32 %s295_s22, 4  ;;  %s299_s1 = sshll.u32 %s290_s8, 4  ;;  %s298_s23 = int_to_ptr.hbm [resolvable:$true] %s297_s23  ;;  %s300_s1 = int_to_ptr.vmem [resolvable:$true] %s299_s1 }
  0x24   : > { %p1275_p10 = pnand %p1290_p4, %p58_p9  ;;  %s287_s3 = scalar_lea.sflag [#allocation3], %s286_s16 }
  0x25   : > { %308 = sbr.rel (%p1709_p7) target bundleno = 760 (0x2f8), region = 40  ;;  %s1749_s12 = sand.u32 (!%p1709_p7), 1, %s1583_s25  }
  0x26   : > { %1277 = dma.hbm_to_vmem [thread:$0]  (!%p1275_p10), %s298_s23, 128, %s300_s1, %s287_s3  }
  0x27   : > { %s1231_s13 = sshll.u32 (!%p1709_p7), %s1749_s12, 3  ;;  %s311_s18 = scalar_lea.sflag (!%p1709_p7), [#allocation3], %s1749_s12 }
  0x28   : > { %s314_s20 = scalar_lea.vmem (!%p1709_p7), [#allocation2], %s1231_s13 }
  0x2a   : > { %1562 = dma.done.wait (%p1696_p3), %s311_s18, 128  }
  0x2b   : > { %1564 = vsyncadd (%p1696_p3), %s311_s18, 4294967168 }
  0x2c   : > { %1566 = dma.done.wait (%p63_p1), [#allocation6], 528  }
  0x2d   : > { %1568 = vsyncadd (%p63_p1), [#allocation6], 4294966768  ;;  %vm369_vm0 = vcmask 261120   ;;  %v366_v0 = vld [vmem:[%s314_s20] sm:$0xff]  ;;  %v1605_v2 = vmov 32.0   ;;  %v407_v23 = vld [vmem:[#allocation7] sm:$0xff] }
  0x2e   : > { %v370_v1 = vsel %vm369_vm0, %v366_v0, 0.0  ;;  %1359 = vrcp.f32 %v1605_v2  ;;  %v410_v14 = vld [vmem:[#allocation7 + $0x18] sm:$0xff]  ;;  %v409_v16 = vld [vmem:[#allocation7 + $0x10] sm:$0xff]  ;;  %v408_v19 = vld [vmem:[#allocation7 + $0x8] sm:$0xff]  ;;  %v436_v27 = vand.u32 4294901760, %v407_v23  ;;  %s1606_s14 = smov 104  }
  0x2f   : > { %371 = vadd.xlane.f32.xlu0 %v370_v1  ;;  %v430_v15 = vand.u32 4294901760, %v410_v14  ;;  %v432_v18 = vand.u32 4294901760, %v409_v16  ;;  %v434_v22 = vand.u32 4294901760, %v408_v19  ;;  %v1356_v47 = vld [vmem:[#allocation5] ss:$0 sm:$0xff]  ;;  %s1607_s16 = smov 112  }
  0x30   : > { %v478_v31 = vsub.f32 %v407_v23, %v436_v27  ;;  %v1357_v50 = vld [vmem:[%s2055_s2] ss:$0 sm:$0xff]  ;;  %s1608_s17 = smov 96   ;;  %s1609_s21 = smov 120   ;;  %vm615_vm5 = vcmask 1047556   ;;  %vm725_vm6 = vcmask 64512  }
  0x31   : > { %v460_v17 = vsub.f32 %v410_v14, %v430_v15  ;;  %531 = vmatpush.msra.mxu3 %v430_v15  ;;  %431 = vmatpush.msra.mxu0 %v430_v15  ;;  %v466_v21 = vsub.f32 %v409_v16, %v432_v18  ;;  %v472_v26 = vsub.f32 %v408_v19, %v434_v22  ;;  %v1358_v59 = vld [vmem:[%s2057_s4] ss:$0 sm:$0xff]  ;;  %s1610_s22 = smov 64   ;;  %v1611_v16 = vmov 1983009808   ;;  %s1834_s23 = sshll.u32 %s1591_s27, 5 }
  0x32   : > { %v479_v34 = vand.u32 4294901760, %v478_v31  ;;  %s1842_s13 = sshll.u32 %s1749_s12, 5  ;;  %s1012_s20 = scalar_lea.hbm %s2058_s5, %s1834_s23 }
  0x33   : > { %v461_v20 = vand.u32 4294901760, %v460_v17  ;;  %502 = vmatpush.msra.mxu2 %v460_v17  ;;  %533 = vmatpush.msra.mxu3 %v432_v18  ;;  %v467_v25 = vand.u32 4294901760, %v466_v21  ;;  %v473_v30 = vand.u32 4294901760, %v472_v26  ;;  %s1860_s1 = scalar_lea.vmem [#allocation8], %s1842_s13  ;;  %s1863_s8 = sshll.u32 %s1012_s20, 4  ;;  %s1016_s8 = int_to_ptr.hbm [resolvable:$true] %s1863_s8 }
  0x34   : > { %v1360_v3 = vpop.eup %1359  ;;  %433 = vmatpush.msra.mxu0 %v432_v18  ;;  %v480_v36 = vsub.f32 %v478_v31, %v479_v34  ;;  %s1013_s3 = sshll.u32 %s1860_s1, 4  ;;  %s1473_s20 = scalar_lea.hbm %s2058_s5, 64  ;;  %s1879_s3 = int_to_ptr.vmem [resolvable:$true] %s1013_s3 }
  0x35   : > { %v374_v4 = vmul.f32 32.0, %v1360_v3  ;;  %vm378_vm1 = vweird.f32 %v1360_v3  ;;  %v462_v24 = vsub.f32 %v460_v17, %v461_v20  ;;  %505 = vmatpush.msra.mxu2 %v466_v21  ;;  %535 = vmatpush.msra.mxu3 %v434_v22  ;;  %v468_v29 = vsub.f32 %v466_v21, %v467_v25 }
  0x36   : > { %435 = vmatpush.msra.mxu0 %v434_v22  ;;  %v474_v33 = vsub.f32 %v472_v26, %v473_v30  ;;  %v481_v37 = vand.u32 4294901760, %v480_v36  ;;  %v620_v17 = vunpack.c.l.s4 %v1611_v16 }
  0x37   : > { %v375_v5 = vsub.f32 1.0, %v374_v4  ;;  %v463_v28 = vand.u32 4294901760, %v462_v24  ;;  %508 = vmatpush.msra.mxu2 %v472_v26  ;;  %537 = vmatpush.msra.mxu3 %v436_v27  ;;  %v469_v32 = vand.u32 4294901760, %v468_v29 }
  0x38   : > { %437 = vmatpush.msra.mxu0 %v436_v27  ;;  %v475_v35 = vand.u32 4294901760, %v474_v33  ;;  %v1775_v21 = vunpack.c.0.s8 %v620_v17 }
  0x39   : > { %v376_v6 = vmul.f32 %v1360_v3, %v375_v5  ;;  %464 = vmatpush.msra.mxu1 %v463_v28  ;;  %511 = vmatpush.msra.mxu2 %v478_v31 }
  0x3a   : > { %560 = vmatpush.msrb.mxu0 %v461_v20 }
  0x3b   : > { %v377_v7 = vadd.f32 %v1360_v3, %v376_v6  ;;  %470 = vmatpush.msra.mxu1 %v469_v32 }
  0x3c   : > { %564 = vmatpush.msrb.mxu0 %v467_v25 }
  0x3d   : > { %v379_v8 = vsel %vm378_vm1, %v1360_v3, %v377_v7  ;;  %476 = vmatpush.msra.mxu1 %v475_v35 }
  0x3e   : > { %568 = vmatpush.msrb.mxu0 %v473_v30 }
  0x3f   : > { %482 = vmatpush.msra.mxu1 %v481_v37 }
  0x40   : > { %572 = vmatpush.msrb.mxu0 %v479_v34  ;;  %v1612_v34 = vmov 1934713408  }
  0x41   : > { %591 = vmatpush.msrb.mxu1 %v430_v15  ;;  %v644_v35 = vunpack.c.l.s4 %v1612_v34 }
  0x43   : > { %593 = vmatpush.msrb.mxu1 %v432_v18 }
  0x45   : > { %595 = vmatpush.msrb.mxu1 %v434_v22 }
  0x47   : > { %597 = vmatpush.msrb.mxu1 %v436_v27 }
  0xa2   : > { %v372_v9 = vpop.xlane.xlu0 %371 }
  0xa3   : > { %v380_v10 = vmul.f32 %v379_v8, %v372_v9 }
  0xa5   : > { %v1762_v11 = vsub.f32 %v366_v0, %v380_v10 }
  0xa7   : > { %v382_v12 = vmul.f32 %v1762_v11, %v1762_v11 }
  0xa9   : > { %v383_v13 = vsel %vm369_vm0, %v382_v12, 0.0 }
  0xaa   : > { %384 = vadd.xlane.f32.xlu0 %v383_v13 }
 0x11d   : > { %v385_v38 = vpop.xlane.xlu0 %384 }
 0x11e   : > { %v386_v39 = vmul.f32 %v385_v38, %v379_v8 }
 0x120   : > { %v387_v40 = vadd.f32 1e-05, %v386_v39 }
 0x122   : > { %1361 = vrsqrt.f32 %v387_v40  ;;  %vm394_vm3 = vweird.f32 %v387_v40 }
 0x128   : > { %v1362_v41 = vpop.eup %1361 }
 0x129   : > { %v389_v42 = vmul.f32 %v1362_v41, %v387_v40  ;;  %vm395_vm2 = vweird.f32 %v1362_v41 }
 0x12a   : > { %vm396_vm4 = vmor %vm394_vm3, %vm395_vm2 }
 0x12b   : > { %v390_v43 = vmul.f32 %v1362_v41, %v389_v42 }
 0x12d   : > { %v391_v44 = vmul.f32 0.5, %v390_v43 }
 0x12f   : > { %v392_v45 = vsub.f32 1.5, %v391_v44 }
 0x131   : > { %v393_v46 = vmul.f32 %v1362_v41, %v392_v45  ;;  %v1789_v45 = vunpack.c.0.s8 %v644_v35 }
 0x133   : > { %v397_v48 = vsel %vm396_vm4, %v1362_v41, %v393_v46 }
 0x134   : > { %v398_v49 = vmul.f32 %v397_v48, %v1762_v11 }
 0x136   : > { %v402_v51 = vmul.f32 %v1356_v47, %v398_v49 }
 0x138   : > { %v406_v52 = vadd.f32 %v1357_v50, %v402_v51 }
 0x13a   : > { %v416_v53 = vsel %vm369_vm0, %v406_v52, 0 }
 0x13b   : > { %v438_v54 = vand.u32 4294901760, %v416_v53 }
 0x13d   : > { %484 = vmatmul.f32.vlgmr.msra.gmra.mxu1 %v438_v54  ;;  %v439_v55 = vsub.f32 %v416_v53, %v438_v54 }
 0x13f   : > { %514 = vmatmul.f32.vlgmr.msra.gmra.mxu2 %v439_v55  ;;  %v440_v56 = vand.u32 4294901760, %v439_v55 }
 0x141   : > { %541 = vmatmul.f32.vlgmr.msra.gmra.mxu3 %v440_v56  ;;  %v441_v57 = vsub.f32 %v439_v55, %v440_v56 }
 0x143   : > { %v442_v58 = vand.u32 4294901760, %v441_v57 }
 0x145   : > { %443 = vmatmul.f32.vlgmr.msra.gmra.mxu0 %v442_v58  ;;  %599 = vmatmul.f32.vlgmr.msrb.gmra.mxu1 %v438_v54 }
 0x14d   : > { %574 = vmatmul.f32.vlgmr.msrb.gmra.mxu0 %v438_v54 }
 0x1ba   : > { %v485_v60 = vpop.f32.mrf.mxu1 }
 0x1c2   : > { %v444_v61 = vpop.f32.mrf.mxu0  ;;  %v515_v0 = vpop.f32.mrf.mxu2 }
 0x1c3   : > { %v445_v62 = vadd.f32 %v1358_v59, %v444_v61  ;;  %v600_v6 = vpop.f32.mrf.mxu1 }
 0x1c4   : > { %v542_v2 = vpop.f32.mrf.mxu3 }
 0x1c5   : > { %v486_v63 = vadd.f32 %v485_v60, %v445_v62 }
 0x1c7   : > { %v516_v1 = vadd.f32 %v515_v0, %v486_v63 }
 0x1c9   : > { %v543_v3 = vadd.f32 %v542_v2, %v516_v1 }
 0x1ca   : > { %v575_v4 = vpop.f32.mrf.mxu0 }
 0x1cb   : > { %v576_v5 = vadd.f32 %v575_v4, %v543_v3 }
 0x1cd   : > { %v601_v7 = vadd.f32 %v600_v6, %v576_v5 }
 0x1cf   : > { %735 = vrot.lane.b32.xlu2 %v601_v7, %s1606_s14  ;;  %733 = vrot.lane.b32.xlu1 %v601_v7, %s1607_s16  ;;  %v603_v8 = vmul.f32 0.35355338, %v601_v7 }
 0x1d1   : > { %v617_v20 = vrot.slane %v603_v8, 4 }
 0x1d7   : > { %737 = vrot.lane.b32.xlu2 %v601_v7, %s1608_s17  ;;  %731 = vrot.lane.b32.xlu1 %v601_v7, %s1609_s21 }
 0x1df   : > { %863 = vrot.lane.b32.xlu2 %v601_v7, %s1610_s22  ;;  %608 = vrot.lane.b32.xlu1 %v603_v8, %s1607_s16  ;;  %s1030_s16 = scalar_lea.hbm %s2059_s6, %s1834_s23 }
 0x1e7   : > { %605 = vrot.lane.b32.xlu2 %v603_v8, %s1609_s21  ;;  %s1467_s21 = sshra.s32 %s1016_s8, 4  ;;  %s1468_s21 = int_to_ptr.hbm [resolvable:$true] %s1467_s21 }
 0x1e8   : > { %p1474_p11 = scmp.lt.s32.totalorder %s1468_s21, %s2058_s5 }
 0x229   : > { %v736_v11 = vpop.permute.xlu2 %735 }
 0x231   : > { %v738_v12 = vpop.permute.xlu2 %737 }
 0x232   : > { %v751_v25 = vrot.slane %v738_v12, 4 }
 0x239   : > { %v864_v13 = vpop.permute.xlu2 %863 }
 0x23a   : > { %v877_v28 = vrot.slane %v864_v13, 4 }
 0x241   : > { %v734_v9 = vpop.permute.xlu1 %733  ;;  %v606_v14 = vpop.permute.xlu2 %605 }
 0x242   : > { %741 = vrot.lane.b32.xlu0 %v734_v9, %s1608_s17  ;;  %867 = vrot.lane.b32.xlu1 %v734_v9, %s1610_s22  ;;  %v629_v39 = vrot.slane %v606_v14, 4 }
 0x249   : > { %v732_v10 = vpop.permute.xlu1 %731 }
 0x24a   : > { %611 = vrot.lane.b32.xlu0 %v603_v8, %s1606_s14  ;;  %739 = vrot.lane.b32.xlu2 %v732_v10, %s1608_s17 }
 0x24b   : > { %743 = vrot.lane.b32.xlu1 %v736_v11, %s1608_s17  ;;  %s990_s17 = scalar_lea.sflag [#allocation4], %s1749_s12 }
 0x251   : > { %v609_v15 = vpop.permute.xlu1 %608 }
 0x252   : > { %869 = vrot.lane.b32.xlu2 %v736_v11, %s1610_s22  ;;  %v614_v19 = vrot.slane %v609_v15, 4  ;;  %v618_v22 = vsel %vm615_vm5, %v609_v15, %v617_v20 }
 0x253   : > { %865 = vrot.lane.b32.xlu1 %v732_v10, %s1610_s22  ;;  %v626_v29 = vperm.slane %v618_v22, %v1775_v21  ;;  %s1469_s22 = scalar_lea.hbm %s1468_s21, 32 }
 0x254   : > { %v616_v26 = vsel %vm615_vm5, %v614_v19, %v603_v8  ;;  %p1470_p1 = scmp.ne.s32.totalorder %s1468_s21, %s1469_s22  ;;  %p1475_p12 = scmp.lt.s32.totalorder %s1473_s20, %s1469_s22 }
 0x255   : > { %v622_v31 = vperm.slane %v616_v26, %v1775_v21  ;;  %v653_v40 = vrot.slane %v626_v29, 4 }
 0x256   : > { %p1471_p3 = pnand %p1470_p1, %p1729_p2  ;;  %p1476_p13 = por %p1475_p12, %p1474_p11 }
 0x257   : > { %v641_v42 = vrot.slane %v622_v31, 4 }
 0x258   : > { %p1472_p7 = pneg %p1471_p3 }
 0x25a   : > { %p1477_p0 = pnand %p1476_p13, %p1472_p7 }
 0x2a4   : > { %v740_v18 = vpop.permute.xlu2 %739 }
 0x2a5   : > { %v763_v43 = vrot.slane %v740_v18, 4 }
 0x2ac   : > { %v1783_v36 = vpop.permute.xlu2 %869 }
 0x2ad   : > { %v887_v47 = vrot.slane %v1783_v36, 4 }
 0x2b4   : > { %v742_v23 = vpop.permute.xlu0 %741  ;;  %v868_v24 = vpop.permute.xlu1 %867 }
 0x2b5   : > { %v749_v27 = vrot.slane %v742_v23, 4  ;;  %v752_v30 = vsel %vm615_vm5, %v742_v23, %v751_v25  ;;  %v875_v33 = vrot.slane %v868_v24, 4  ;;  %v878_v38 = vsel %vm615_vm5, %v868_v24, %v877_v28 }
 0x2b6   : > { %v760_v37 = vperm.slane %v752_v30, %v1775_v21  ;;  %v1793_v48 = vperm.slane %v878_v38, %v1775_v21 }
 0x2b7   : > { %v750_v32 = vsel %vm615_vm5, %v749_v27, %v738_v12  ;;  %v876_v44 = vsel %vm615_vm5, %v875_v33, %v864_v13 }
 0x2b8   : > { %v756_v41 = vperm.slane %v750_v32, %v1775_v21  ;;  %v787_v52 = vrot.slane %v760_v37, 4  ;;  %v1799_v57 = vperm.slane %v876_v44, %v1775_v21 }
 0x2ba   : > { %v775_v56 = vrot.slane %v756_v41, 4 }
 0x2bc   : > { %v612_v46 = vpop.permute.xlu0 %611 }
 0x2bd   : > { %v627_v49 = vrot.slane %v612_v46, 4  ;;  %v630_v50 = vsel %vm615_vm5, %v612_v46, %v629_v39  ;;  %v744_v51 = vpop.permute.xlu1 %743 }
 0x2be   : > { %v638_v53 = vperm.slane %v630_v50, %v1775_v21  ;;  %v761_v54 = vrot.slane %v744_v51, 4  ;;  %v764_v55 = vsel %vm615_vm5, %v744_v51, %v763_v43 }
 0x2bf   : > { %v628_v58 = vsel %vm615_vm5, %v627_v49, %v606_v14  ;;  %v772_v59 = vperm.slane %v764_v55, %v1775_v21 }
 0x2c0   : > { %v634_v60 = vperm.slane %v628_v58, %v1775_v21  ;;  %v651_v61 = vrot.slane %v638_v53, 4  ;;  %v654_v62 = vsel %vm615_vm5, %v638_v53, %v653_v40  ;;  %v762_v63 = vsel %vm615_vm5, %v761_v54, %v740_v18 }
 0x2c1   : > { %v662_v0 = vperm.slane %v654_v62, %v1789_v45  ;;  %v768_v1 = vperm.slane %v762_v63, %v1775_v21  ;;  %v785_v2 = vrot.slane %v772_v59, 4  ;;  %v788_v3 = vsel %vm615_vm5, %v772_v59, %v787_v52 }
 0x2c2   : > { %v639_v4 = vrot.slane %v634_v60, 4  ;;  %v642_v5 = vsel %vm615_vm5, %v634_v60, %v641_v42  ;;  %v652_v6 = vsel %vm615_vm5, %v651_v61, %v626_v29  ;;  %v796_v7 = vperm.slane %v788_v3, %v1789_v45 }
 0x2c3   : > { %v650_v8 = vperm.slane %v642_v5, %v1789_v45  ;;  %v658_v9 = vperm.slane %v652_v6, %v1789_v45  ;;  %v669_v10 = vrot.slane %v662_v0, 4  ;;  %v773_v11 = vrot.slane %v768_v1, 4 }
 0x2c4   : > { %v640_v12 = vsel %vm615_vm5, %v639_v4, %v622_v31  ;;  %v776_v13 = vsel %vm615_vm5, %v768_v1, %v775_v56  ;;  %v786_v14 = vsel %vm615_vm5, %v785_v2, %v760_v37  ;;  %v803_v15 = vrot.slane %v796_v7, 4 }
 0x2c5   : > { %v646_v16 = vperm.slane %v640_v12, %v1789_v45  ;;  %v665_v17 = vrot.slane %v650_v8, 4  ;;  %v667_v18 = vrot.slane %v658_v9, 4  ;;  %v670_v19 = vsel %vm615_vm5, 0.0, %v669_v10  ;;  %v866_v6 = vpop.permute.xlu1 %865 }
 0x2c6   : > { %v682_v20 = vsel %vm615_vm5, %v669_v10, %v658_v9  ;;  %v687_v22 = vrot.slane %v670_v19, 4  ;;  %v774_v23 = vsel %vm615_vm5, %v773_v11, %v756_v41  ;;  %v784_v24 = vperm.slane %v776_v13, %v1789_v45 }
 0x2c7   : > { %v663_v25 = vrot.slane %v646_v16, 4  ;;  %v666_v26 = vsel %vm615_vm5, 0.0, %v665_v17  ;;  %v668_v27 = vsel %vm615_vm5, 0.0, %v667_v18  ;;  %v671_v28 = vsel %vm615_vm5, %v665_v17, %v646_v16 }
 0x2c8   : > { %v675_v29 = vperm.slane %v671_v28, %v1775_v21  ;;  %v676_v30 = vrot.slane %v666_v26, 4  ;;  %v686_v31 = vperm.slane %v682_v20, %v1775_v21  ;;  %v688_v32 = vsel %vm615_vm5, %v687_v22, %v668_v27 }
 0x2c9   : > { %v664_v33 = vsel %vm615_vm5, 0.0, %v663_v25  ;;  %v692_v34 = vperm.slane %v688_v32, %v1775_v21  ;;  %v780_v35 = vperm.slane %v774_v23, %v1789_v45  ;;  %v792_v37 = vperm.slane %v786_v14, %v1789_v45 }
 0x2ca   : > { %v677_v38 = vsel %vm615_vm5, %v676_v30, %v664_v33  ;;  %v695_v39 = vrot.slane %v675_v29, 4  ;;  %v707_v40 = vrot.slane %v686_v31, 4  ;;  %v799_v41 = vrot.slane %v784_v24, 4 }
 0x2cb   : > { %v681_v42 = vperm.slane %v677_v38, %v1775_v21  ;;  %v705_v43 = vrot.slane %v692_v34, 4  ;;  %v797_v44 = vrot.slane %v780_v35, 4  ;;  %v801_v46 = vrot.slane %v792_v37, 4 }
 0x2cc   : > { %v708_v49 = vsel %vm615_vm5, %v692_v34, %v707_v40  ;;  %v800_v50 = vsel %vm615_vm5, 0.0, %v799_v41  ;;  %v804_v51 = vsel %vm615_vm5, 0.0, %v803_v15  ;;  %v805_v52 = vsel %vm615_vm5, %v799_v41, %v780_v35 }
 0x2cd   : > { %v693_v53 = vrot.slane %v681_v42, 4  ;;  %v696_v54 = vsel %vm615_vm5, %v681_v42, %v695_v39  ;;  %v706_v55 = vsel %vm615_vm5, %v705_v43, %v686_v31  ;;  %v716_v56 = vperm.slane %v708_v49, %v1789_v45 }
 0x2ce   : > { %v704_v58 = vperm.slane %v696_v54, %v1789_v45  ;;  %v712_v59 = vperm.slane %v706_v55, %v1789_v45  ;;  %v798_v60 = vsel %vm615_vm5, 0.0, %v797_v44  ;;  %v802_v61 = vsel %vm615_vm5, 0.0, %v801_v46 }
 0x2cf   : > { %v694_v62 = vsel %vm615_vm5, %v693_v53, %v675_v29  ;;  %v721_v63 = vrot.slane %v716_v56, 4  ;;  %v809_v0 = vperm.slane %v805_v52, %v1775_v21  ;;  %v810_v1 = vrot.slane %v800_v50, 4 }
 0x2d0   : > { %v700_v2 = vperm.slane %v694_v62, %v1789_v45  ;;  %v717_v3 = vrot.slane %v712_v59, 4  ;;  %v723_v4 = vrot.slane %v704_v58, 4  ;;  %v816_v5 = vsel %vm615_vm5, %v803_v15, %v792_v37 }
 0x2d1   : > { %v722_v7 = vsel %vm615_vm5, %v721_v63, %v704_v58  ;;  %v811_v8 = vsel %vm615_vm5, %v810_v1, %v798_v60  ;;  %v820_v9 = vperm.slane %v816_v5, %v1775_v21  ;;  %v821_v10 = vrot.slane %v804_v51, 4 }
 0x2d2   : > { %v718_v11 = vsel %vm615_vm5, %v717_v3, %v700_v2  ;;  %v719_v12 = vrot.slane %v700_v2, 4  ;;  %v724_v13 = vsel %vm615_vm5, %v716_v56, %v723_v4  ;;  %v815_v14 = vperm.slane %v811_v8, %v1775_v21  ;;  %728 = vst.msk [vmem:[%s1860_s1 + $0x10] sm:$0xff] %vm725_vm6, %v722_v7 }
 0x2d3   : > { %v822_v15 = vsel %vm615_vm5, %v821_v10, %v802_v61  ;;  %v829_v16 = vrot.slane %v809_v0, 4  ;;  %v841_v17 = vrot.slane %v820_v9, 4  ;;  %v888_v18 = vsel %vm615_vm5, %v887_v47, %v866_v6  ;;  %726 = vst.msk [vmem:[%s1860_s1] sm:$0xff] %vm725_vm6, %v718_v11 }
 0x2d4   : > { %v720_v19 = vsel %vm615_vm5, %v712_v59, %v719_v12  ;;  %v826_v20 = vperm.slane %v822_v15, %v1775_v21  ;;  %v827_v22 = vrot.slane %v815_v14, 4  ;;  %v889_v23 = vrot.slane %v866_v6, 4  ;;  %729 = vst.msk [vmem:[%s1860_s1 + $0x18] sm:$0xff] %vm725_vm6, %v724_v13 }
 0x2d5   : > { %v901_v24 = vrot.slane %v1799_v57, 4  ;;  %v913_v47 = vrot.slane %v1793_v48, 4  ;;  %v830_v25 = vsel %vm615_vm5, %v815_v14, %v829_v16  ;;  %v894_v26 = vperm.slane %v888_v18, %v1775_v21  ;;  %727 = vst.msk [vmem:[%s1860_s1 + $0x8] sm:$0xff] %vm725_vm6, %v720_v19 }
 0x2d6   : > { %v828_v27 = vsel %vm615_vm5, %v827_v22, %v809_v0  ;;  %v838_v28 = vperm.slane %v830_v25, %v1789_v45  ;;  %v839_v29 = vrot.slane %v826_v20, 4  ;;  %v842_v30 = vsel %vm615_vm5, %v826_v20, %v841_v17 }
 0x2d7   : > { %1480 = shalt.err (!%p1477_p0)
}
 0x2d8   : > { %s1613_s12 = smov 128   ;;  %s1614_s14 = smov 8   ;;  %v834_v31 = vperm.slane %v828_v27, %v1789_v45  ;;  %v850_v32 = vperm.slane %v842_v30, %v1789_v45  ;;  %v890_v33 = vsel %vm615_vm5, %v1783_v36, %v889_v23  ;;  %v899_v34 = vrot.slane %v894_v26, 4 }
 0x2d9   : > { %1261 = dma.vmem_to_hbm [thread:$0]  (%p1729_p2), %s1879_s3, 512, %s1016_s8, %s990_s17, %s1613_s12, %s1613_s12, %s1614_s14   ;;  %v840_v35 = vsel %vm615_vm5, %v839_v29, %v820_v9  ;;  %v857_v37 = vrot.slane %v838_v28, 4  ;;  %v898_v38 = vperm.slane %v890_v33, %v1775_v21  ;;  %v902_v39 = vsel %vm615_vm5, %v894_v26, %v901_v24 }
 0x2da   : > { %s994_s21 = sand.u32 1, %s1686_s30   ;;  %v846_v40 = vperm.slane %v840_v35, %v1789_v45  ;;  %v853_v41 = vrot.slane %v834_v31, 4  ;;  %v855_v42 = vrot.slane %v850_v32, 4  ;;  %v900_v43 = vsel %vm615_vm5, %v899_v34, %v1799_v57  ;;  %s358_s3 = scalar_lea.vmem [#allocation9], %s1842_s13 }
 0x2db   : > { %s1031_s8 = sshll.u32 %s358_s3, 4  ;;  %s1935_s27 = sshll.u32 %s1030_s16, 4  ;;  %v858_v36 = vsel %vm615_vm5, %v850_v32, %v857_v37  ;;  %v906_v44 = vperm.slane %v900_v43, %v1789_v45  ;;  %v910_v46 = vperm.slane %v902_v39, %v1789_v45  ;;  %v911_v49 = vrot.slane %v898_v38, 4  ;;  %s1948_s8 = int_to_ptr.vmem [resolvable:$true] %s1031_s8  ;;  %s1034_s27 = int_to_ptr.hbm [resolvable:$true] %s1935_s27 }
 0x2dc   : > { %v851_v50 = vrot.slane %v846_v40, 4  ;;  %v854_v51 = vsel %vm615_vm5, %v846_v40, %v853_v41  ;;  %v856_v57 = vsel %vm615_vm5, %v855_v42, %v838_v28  ;;  %v914_v52 = vsel %vm615_vm5, %v898_v38, %v913_v47  ;;  %862 = vst.msk [vmem:[%s358_s3 + $0x18] sm:$0xff] %vm725_vm6, %v858_v36  ;;  %s1961_s16 = scalar_lea.sflag [#allocation10], %s994_s21  ;;  %s1495_s18 = sshra.s32 %s1034_s27, 4  ;;  %s1496_s18 = int_to_ptr.hbm [resolvable:$true] %s1495_s18 }
 0x2dd   : > { %v912_v53 = vsel %vm615_vm5, %v911_v49, %v1793_v48  ;;  %v922_v54 = vperm.slane %v914_v52, %v1789_v45  ;;  %v923_v55 = vrot.slane %v906_v44, 4  ;;  %v925_v56 = vrot.slane %v910_v46, 4  ;;  %860 = vst.msk [vmem:[%s358_s3 + $0x8] sm:$0xff] %vm725_vm6, %v854_v51  ;;  %s1497_s20 = scalar_lea.hbm %s1496_s18, 32  ;;  %s1501_s17 = scalar_lea.hbm %s2059_s6, 64 }
 0x2de   : > { %v852_v58 = vsel %vm615_vm5, %v851_v50, %v834_v31  ;;  %v918_v59 = vperm.slane %v912_v53, %v1789_v45  ;;  %861 = vst.msk [vmem:[%s358_s3 + $0x10] sm:$0xff] %vm725_vm6, %v856_v57  ;;  %p1498_p4 = scmp.ne.s32.totalorder %s1496_s18, %s1497_s20  ;;  %p1502_p10 = scmp.lt.s32.totalorder %s1496_s18, %s2059_s6 }
 0x2df   : > { %v924_v48 = vsel %vm615_vm5, 0.0, %v923_v55  ;;  %v926_v60 = vsel %vm615_vm5, 0.0, %v925_v56  ;;  %v929_v61 = vrot.slane %v922_v54, 4  ;;  %v931_v62 = vsel %vm615_vm5, %v925_v56, %v906_v44  ;;  %859 = vst.msk [vmem:[%s358_s3] sm:$0xff] %vm725_vm6, %v852_v58  ;;  %p1503_p1 = scmp.lt.s32.totalorder %s1501_s17, %s1497_s20 }
 0x2e0   : > { %v927_v63 = vrot.slane %v918_v59, 4  ;;  %v935_v0 = vperm.slane %v931_v62, %v1775_v21  ;;  %v936_v1 = vrot.slane %v926_v60, 4  ;;  %p1499_p6 = pnand %p1498_p4, %p1729_p2 }
 0x2e1   : > { %p1504_p3 = por %p1503_p1, %p1502_p10 }
 0x2e2   : > { %p1500_p9 = pneg %p1499_p6 }
 0x2e4   : > { %p1505_p7 = pnand %p1504_p3, %p1500_p9 }
 0x2e6   : > { %1508 = shalt.err (!%p1505_p7)
}
 0x2e7   : > { %1262 = dma.vmem_to_hbm [thread:$0]  (%p1729_p2), %s1948_s8, 512, %s1034_s27, %s1961_s16, %s1613_s12, %s1613_s12, %s1614_s14   ;;  %v930_v2 = vsel %vm615_vm5, 0.0, %v929_v61  ;;  %v942_v3 = vsel %vm615_vm5, %v929_v61, %v918_v59  ;;  %v928_v4 = vsel %vm615_vm5, 0.0, %v927_v63  ;;  %v937_v5 = vsel %vm615_vm5, %v936_v1, %v924_v48 }
 0x2e8   : > { %v946_v6 = vperm.slane %v942_v3, %v1775_v21  ;;  %v947_v7 = vrot.slane %v930_v2, 4  ;;  %v941_v8 = vperm.slane %v937_v5, %v1775_v21  ;;  %v955_v9 = vrot.slane %v935_v0, 4  ;;  %s1048_s8 = scalar_lea.hbm %s2060_s7, %s1834_s23  ;;  %s365_s18 = scalar_lea.vmem [#allocation11], %s1842_s13 }
 0x2e9   : > { %s2003_s27 = sshll.u32 %s1048_s8, 4  ;;  %s1049_s20 = sshll.u32 %s365_s18, 4  ;;  %s1050_s20 = int_to_ptr.vmem [resolvable:$true] %s1049_s20  ;;  %s1052_s27 = int_to_ptr.hbm [resolvable:$true] %s2003_s27 }
 0x2ea   : > { %v948_v10 = vsel %vm615_vm5, %v947_v7, %v928_v4  ;;  %v967_v11 = vrot.slane %v946_v6, 4  ;;  %v953_v13 = vrot.slane %v941_v8, 4  ;;  %v956_v14 = vsel %vm615_vm5, %v941_v8, %v955_v9  ;;  %s1523_s23 = sshra.s32 %s1052_s27, 4  ;;  %s1529_s17 = scalar_lea.hbm %s2060_s7, 64  ;;  %s1524_s23 = int_to_ptr.hbm [resolvable:$true] %s1523_s23 }
 0x2eb   : > { %v952_v12 = vperm.slane %v948_v10, %v1775_v21  ;;  %v964_v15 = vperm.slane %v956_v14, %v1789_v45  ;;  %s1525_s13 = scalar_lea.hbm %s1524_s23, 32  ;;  %p1530_p0 = scmp.lt.s32.totalorder %s1524_s23, %s2060_s7 }
 0x2ec   : > { %v954_v16 = vsel %vm615_vm5, %v953_v13, %v935_v0  ;;  %p1526_p11 = scmp.ne.s32.totalorder %s1524_s23, %s1525_s13  ;;  %p1531_p4 = scmp.lt.s32.totalorder %s1529_s17, %s1525_s13 }
 0x2ed   : > { %v965_v17 = vrot.slane %v952_v12, 4  ;;  %v968_v18 = vsel %vm615_vm5, %v952_v12, %v967_v11  ;;  %v960_v19 = vperm.slane %v954_v16, %v1789_v45  ;;  %v983_v21 = vrot.slane %v964_v15, 4 }
 0x2ee   : > { %v976_v20 = vperm.slane %v968_v18, %v1789_v45  ;;  %p1527_p12 = pnand %p1526_p11, %p1729_p2  ;;  %p1532_p6 = por %p1531_p4, %p1530_p0 }
 0x2ef   : > { %v966_v22 = vsel %vm615_vm5, %v965_v17, %v946_v6  ;;  %v979_v24 = vrot.slane %v960_v19, 4 }
 0x2f0   : > { %v972_v23 = vperm.slane %v966_v22, %v1789_v45  ;;  %v981_v47 = vrot.slane %v976_v20, 4  ;;  %v984_v25 = vsel %vm615_vm5, %v976_v20, %v983_v21  ;;  %p1528_p13 = pneg %p1527_p12 }
 0x2f1   : > { %988 = vst.msk [vmem:[%s365_s18 + $0x18] sm:$0xff] %vm725_vm6, %v984_v25 }
 0x2f2   : > { %v977_v26 = vrot.slane %v972_v23, 4  ;;  %v980_v27 = vsel %vm615_vm5, %v972_v23, %v979_v24  ;;  %v982_v28 = vsel %vm615_vm5, %v981_v47, %v964_v15  ;;  %p1533_p9 = pnand %p1532_p6, %p1528_p13 }
 0x2f3   : > { %986 = vst.msk [vmem:[%s365_s18 + $0x8] sm:$0xff] %vm725_vm6, %v980_v27 }
 0x2f4   : > { %v978_v45 = vsel %vm615_vm5, %v977_v26, %v960_v19  ;;  %987 = vst.msk [vmem:[%s365_s18 + $0x10] sm:$0xff] %vm725_vm6, %v982_v28 }
 0x2f5   : > { %985 = vst.msk [vmem:[%s365_s18] sm:$0xff] %vm725_vm6, %v978_v45 }
 0x2f6   : > { %1536 = shalt.err (!%p1533_p9)
}
 0x2f7   : > { %1263 = dma.vmem_to_hbm [thread:$0]  (%p1729_p2), %s1050_s20, 512, %s1052_s27, %s1961_s16, %s1613_s12, %s1613_s12, %s1614_s14  }
 0x2f8 PF: > { %s1066_s30 = sand.u32 1, %s1579_s24   ;;  %p1279_p10 = pnand %p1227_p8, %p1701_p5 }
 0x2f9   : > { %s1067_s21 = scalar_lea.sflag [#allocation4], %s1066_s30 }
 0x2fa   : > { %p1280_p1 = pneg %p1279_p10 }
 0x2fc   : > { %1570 = dma.done.wait (%p1280_p1), %s1067_s21, 512  }
 0x2fd   : > { %1572 = vsyncadd (%p1280_p1), %s1067_s21, 4294966784  ;;  %s2070_s8 = sadd.s32 4294967294, %s1599_s29  }
 0x2fe   : > { %s1076_s15 = sand.u32 1, %s2070_s8  }
 0x2ff   : > { %s1077_s18 = scalar_lea.sflag [#allocation10], %s1076_s15 }
 0x300   : > { %1574 = dma.done.wait (%p1280_p1), %s1077_s18, 1024  }
 0x301   : > { %1576 = vsyncadd (%p1280_p1), %s1077_s18, 4294966272  ;;  %s28_s29 = sadd.s32 1, %s1599_s29   ;;  %s2071_s24 = smov %s1583_s25 }
 0x302   : > { %p25_p2 = scmp.ge.s32.totalorder %s28_s29, 4   ;;  %s2072_s25 = smov %s1587_s26 }
 0x303   : > { %s2073_s26 = smov %s1739_s19  ;;  %s2074_s27 = smov %s1595_s28 }
 0x304   : > { %s2075_s28 = smov %s2077_s11  ;;  %27 = sbr.rel (!%p25_p2) target bundleno = 12 (0xc), region = 125 }
 0x309   :  { %1093 = vsyncpa [#allocation3], 1 }
 0x30a   :  { %1095 = vsyncpa [#allocation3 + $0x1], 1 }
 0x30b   :  { %1096 = vsyncpa [#allocation6], 1 }
 0x30c   :  { %1097 = vsyncpa [#allocation4], 1 }
 0x30d   :  { %1099 = vsyncpa [#allocation4 + $0x1], 1 }
 0x30e   :  { %1100 = vsyncpa [#allocation10], 1 }
 0x30f   :  { %1102 = vsyncpa [#allocation10 + $0x1], 1 }

</bundles_post_ra>
